<compile_context>
chip_gen: v6e
topology: v6e:2x2x1
jax: 0.10.0
libtpu: 0.0.40
codegen_flags: <defaults>
</compile_context>

<pallas_src>
import functools

import jax
import jax.numpy as jnp
from jax import lax
from jax.experimental import pallas as pl
from jax.experimental.pallas import tpu as pltpu


# ---------------------------------------------------------------------------
# Generation-aware sizing
# ---------------------------------------------------------------------------
def _tpu_vmem_bytes(default=128 << 20):
    try:
        return int(pltpu.get_tpu_info().vmem_capacity_bytes)
    except Exception:
        return default


_VMEM_BYTES = _tpu_vmem_bytes()
# Leave headroom below physical capacity; never below the default scoped limit.
_VMEM_LIMIT = int(max(32 << 20, min(_VMEM_BYTES - (12 << 20), 100 << 20)))
# v7x (64 MiB VMEM) gets a smaller q-tile budget than v5e/v6e (128 MiB).
_SEQ_MAX_TILE = 128 if _VMEM_BYTES <= (64 << 20) else 256


def _pick_tile(n, max_tile, pref_mult=128, base_mult=8):
    """Largest tile <= max_tile dividing n, preferring multiples of pref_mult."""
    if n <= max_tile:
        return n
    for mult in (pref_mult, base_mult):
        best = None
        t = mult
        while t <= max_tile:
            if n % t == 0:
                best = t
            t += mult
        if best is not None:
            return best
    return n  # full dim (always a legal block)


def _const_spec(shape, grid_ndim):
    """Full-array block whose index is constant across the grid."""
    nd = len(shape)
    if grid_ndim == 2:
        return pl.BlockSpec(shape, lambda b, i, _nd=nd: (0,) * _nd)
    return pl.BlockSpec(shape, lambda b, i, k, _nd=nd: (0,) * _nd)


# ---------------------------------------------------------------------------
# Kernels
# ---------------------------------------------------------------------------
def mha_add_ln_kernel(src_q_ref, src_kv_ref, mask_ref,
                      wq_ref, bq_ref, wk_ref, bk_ref, wv_ref, bv_ref,
                      wo_ref, bo_ref, g_ref, beta_ref, out_ref,
                      k_scr, v_scr, *, n_heads, head_dim, eps):
    """LayerNorm(src + MHA(src, src, src, mask)) for one (batch, q-tile).

    Grid = (batch [parallel], q-tiles [arbitrary]).  K/V are projected once
    per batch element (q-tile 0) into bf16 head-major VMEM scratch and reused
    by every subsequent q-tile of that batch element.
    """
    i = pl.program_id(1)

    @pl.when(i == 0)
    def _():
        x_kv = src_kv_ref[0].astype(jnp.bfloat16)                 # [Lk, H]
        K = jnp.dot(x_kv, wk_ref[...],
                    preferred_element_type=jnp.float32) + bk_ref[...]
        V = jnp.dot(x_kv, wv_ref[...],
                    preferred_element_type=jnp.float32) + bv_ref[...]
        Lk = K.shape[0]
        k_scr[...] = (K.reshape(Lk, n_heads, head_dim)
                      .transpose(1, 0, 2).astype(jnp.bfloat16))   # [h, Lk, d]
        v_scr[...] = (V.reshape(Lk, n_heads, head_dim)
                      .transpose(1, 0, 2).astype(jnp.bfloat16))   # [h, Lk, d]

    x_q_f32 = src_q_ref[0].astype(jnp.float32)                    # residual [Tq, H]
    xq = src_q_ref[0].astype(jnp.bfloat16)

    # 1/sqrt(head_dim) is already folded into wq/bq at prep time.
    Q = jnp.dot(xq, wq_ref[...],
                preferred_element_type=jnp.float32) + bq_ref[...]  # [Tq, H]
    Tq = Q.shape[0]
    Qh = (Q.reshape(Tq, n_heads, head_dim)
          .transpose(1, 0, 2).astype(jnp.bfloat16))                # [h, Tq, d]

    # Heads batched in a single MXU contraction (batch dim leading).
    energy = jnp.einsum('hqd,hkd->hqk', Qh, k_scr[...],
                        preferred_element_type=jnp.float32)        # [h, Tq, Lk]

    # Mask: one compare/select on [Tq, Lk], broadcast-added over heads.
    bias = jnp.where(mask_ref[0] == 0, jnp.float32(-1e10), jnp.float32(0.0))
    energy = energy + bias[None, :, :]

    m = jnp.max(energy, axis=-1, keepdims=True)
    p = jnp.exp(energy - m)
    attn = p * pl.reciprocal(jnp.sum(p, axis=-1, keepdims=True), approx=True)

    ctx = jnp.einsum('hqk,hkd->hqd', attn.astype(jnp.bfloat16), v_scr[...],
                     preferred_element_type=jnp.float32)           # [h, Tq, d]
    ctx = ctx.transpose(1, 0, 2).reshape(Tq, n_heads * head_dim)   # [Tq, H]

    attn_out = (jnp.dot(ctx.astype(jnp.bfloat16), wo_ref[...],
                        preferred_element_type=jnp.float32) + bo_ref[...])

    # residual + LayerNorm (dropout = identity in eval mode), all in f32.
    z = x_q_f32 + attn_out
    mean = jnp.mean(z, axis=-1, keepdims=True)
    var = jnp.mean((z - mean) ** 2, axis=-1, keepdims=True)
    y = (z - mean) * lax.rsqrt(var + eps)
    out_ref[0] = (y * g_ref[...] + beta_ref[...]).astype(out_ref.dtype)


def ffn_add_ln_kernel(x_ref, w1_ref, b1_ref, w2_ref, b2_ref,
                      g_ref, beta_ref, out_ref, acc_ref, *, eps):
    """LayerNorm(x + FFN(x)), pf dimension tiled along grid axis 2."""
    kpf = pl.program_id(2)

    @pl.when(kpf == 0)
    def _():
        acc_ref[...] = jnp.zeros_like(acc_ref)

    xb = x_ref[0].astype(jnp.bfloat16)                              # [T, H]
    h = jnp.dot(xb, w1_ref[...],
                preferred_element_type=jnp.float32) + b1_ref[...]   # [T, tpf]
    h = jnp.maximum(h, 0.0)
    acc_ref[...] += jnp.dot(h.astype(jnp.bfloat16), w2_ref[...],
                            preferred_element_type=jnp.float32)     # [T, H]

    @pl.when(kpf == pl.num_programs(2) - 1)
    def _():
        z = x_ref[0].astype(jnp.float32) + acc_ref[...] + b2_ref[...]
        mean = jnp.mean(z, axis=-1, keepdims=True)
        var = jnp.mean((z - mean) ** 2, axis=-1, keepdims=True)
        y = (z - mean) * lax.rsqrt(var + eps)
        out_ref[0] = (y * g_ref[...] + beta_ref[...]).astype(out_ref.dtype)


# ---------------------------------------------------------------------------
# Wrappers (pallas_call glue)
# ---------------------------------------------------------------------------
def mha_add_ln(src, mask, attn_p, n_heads, head_dim, gamma, beta, eps=1e-5):
    B, L, H = src.shape
    tq = _pick_tile(L, _SEQ_MAX_TILE)
    grid = (B, L // tq)

    kernel = functools.partial(mha_add_ln_kernel, n_heads=n_heads,
                               head_dim=head_dim, eps=eps)
    return pl.pallas_call(
        kernel,
        out_shape=jax.ShapeDtypeStruct((B, L, H), src.dtype),
        grid=grid,
        in_specs=[
            pl.BlockSpec((1, tq, H), lambda b, i: (b, i, 0)),   # q tile / residual
            pl.BlockSpec((1, L, H), lambda b, i: (b, 0, 0)),    # K/V source (per-b)
            pl.BlockSpec((1, tq, L), lambda b, i: (b, i, 0)),   # mask tile
            _const_spec(attn_p["wq_t"].shape, 2), _const_spec(attn_p["bq"].shape, 2),
            _const_spec(attn_p["wk_t"].shape, 2), _const_spec(attn_p["bk"].shape, 2),
            _const_spec(attn_p["wv_t"].shape, 2), _const_spec(attn_p["bv"].shape, 2),
            _const_spec(attn_p["wo_t"].shape, 2), _const_spec(attn_p["bo"].shape, 2),
            _const_spec(gamma.shape, 2), _const_spec(beta.shape, 2),
        ],
        out_specs=pl.BlockSpec((1, tq, H), lambda b, i: (b, i, 0)),
        scratch_shapes=[
            pltpu.VMEM((n_heads, L, head_dim), jnp.bfloat16),   # K cache (head-major)
            pltpu.VMEM((n_heads, L, head_dim), jnp.bfloat16),   # V cache (head-major)
        ],
        compiler_params=pltpu.CompilerParams(
            dimension_semantics=("parallel", "arbitrary"),
            vmem_limit_bytes=_VMEM_LIMIT),
    )(src, src, mask,
      attn_p["wq_t"], attn_p["bq"], attn_p["wk_t"], attn_p["bk"],
      attn_p["wv_t"], attn_p["bv"], attn_p["wo_t"], attn_p["bo"],
      gamma, beta)


def ffn_add_ln(x, ffn_p, gamma, beta, eps=1e-5):
    B, L, H = x.shape
    pf = ffn_p["w1_t"].shape[1]

    tl = _pick_tile(L, _SEQ_MAX_TILE)
    # pf tile must be a multiple of 128 (it is the lane dim of the w1 block
    # and the sublane dim of the bf16 w2 block) or the full pf.
    tpf = _pick_tile(pf, 512, pref_mult=128, base_mult=128)
    grid = (B, L // tl, pf // tpf)

    kernel = functools.partial(ffn_add_ln_kernel, eps=eps)
    return pl.pallas_call(
        kernel,
        out_shape=jax.ShapeDtypeStruct((B, L, H), x.dtype),
        grid=grid,
        in_specs=[
            pl.BlockSpec((1, tl, H), lambda b, i, k: (b, i, 0)),
            pl.BlockSpec((H, tpf), lambda b, i, k: (0, k)),     # w1 block
            pl.BlockSpec((1, tpf), lambda b, i, k: (0, k)),     # b1 block
            pl.BlockSpec((tpf, H), lambda b, i, k: (k, 0)),     # w2 block
            _const_spec(ffn_p["b2"].shape, 3),
            _const_spec(gamma.shape, 3), _const_spec(beta.shape, 3),
        ],
        out_specs=pl.BlockSpec((1, tl, H), lambda b, i, k: (b, i, 0)),
        scratch_shapes=[pltpu.VMEM((tl, H), jnp.float32)],      # FFN accumulator
        compiler_params=pltpu.CompilerParams(
            dimension_semantics=("parallel", "parallel", "arbitrary"),
            vmem_limit_bytes=_VMEM_LIMIT),
    )(x, ffn_p["w1_t"], ffn_p["b1"], ffn_p["w2_t"], ffn_p["b2"], gamma, beta)


# ---------------------------------------------------------------------------
# One-time parameter prep (hoisted out of the per-call wrappers)
# ---------------------------------------------------------------------------
def prepare_params(params):
    """Transpose to [in, out], cast weights to bf16, fold 1/sqrt(d) into Wq/bq."""
    n_heads = params["n_heads"]
    wq, bq, wk, bk, wv, bv, wo, bo = params["self_attn"]
    H = wq.shape[0]
    head_dim = H // n_heads
    inv_scale = 1.0 / (float(head_dim) ** 0.5)
    w1, b1, w2, b2 = params["ffn"]

    t16 = lambda w: w.T.astype(jnp.bfloat16)
    f32 = lambda v: v.astype(jnp.float32)

    return {
        "n_heads": n_heads,
        "head_dim": head_dim,
        "ln_gamma": f32(params["ln_gamma"]),
        "ln_beta": f32(params["ln_beta"]),
        "attn": {
            "wq_t": (wq.T * inv_scale).astype(jnp.bfloat16),
            "bq": f32(bq) * inv_scale,
            "wk_t": t16(wk), "bk": f32(bk),
            "wv_t": t16(wv), "bv": f32(bv),
            "wo_t": t16(wo), "bo": f32(bo),
        },
        "ffn": {"w1_t": t16(w1), "b1": f32(b1), "w2_t": t16(w2), "b2": f32(b2)},
    }


# ---------------------------------------------------------------------------
# EncoderLayer forward
# ---------------------------------------------------------------------------
def encoder_layer_forward(src, src_mask, prepped):
    """src: [B, L, H] f32, src_mask: [B, L, L] int (0 = masked out)."""
    g, b = prepped["ln_gamma"], prepped["ln_beta"]
    # self attention + residual + LayerNorm (dropout = identity)
    src = mha_add_ln(src, src_mask, prepped["attn"],
                     prepped["n_heads"], prepped["head_dim"], g, b)
    # position-wise feed-forward + residual + LayerNorm
    src = ffn_add_ln(src, prepped["ffn"], g, b)
    return src


# ---------------------------------------------------------------------------
# Pure-JAX reference (mirrors the torch module) for correctness checking
# ---------------------------------------------------------------------------
def reference_encoder_layer(src, mask, params, eps=1e-5):
    n_heads = params["n_heads"]
    H = src.shape[-1]
    head_dim = H // n_heads
    scale = float(head_dim) ** 0.5

    def linear(x, w, b):
        return x @ w.T + b

    def layer_norm(x, g, b):
        mean = x.mean(-1, keepdims=True)
        var = ((x - mean) ** 2).mean(-1, keepdims=True)
        return (x - mean) * lax.rsqrt(var + eps) * g + b

    def mha(q, k, v, mask, p):
        wq, bq, wk, bk, wv, bv, wo, bo = p
        B, Lq, _ = q.shape
        Lk = k.shape[1]
        Q = linear(q, wq, bq).reshape(B, Lq, n_heads, head_dim).transpose(0, 2, 1, 3)
        K = linear(k, wk, bk).reshape(B, Lk, n_heads, head_dim).transpose(0, 2, 1, 3)
        V = linear(v, wv, bv).reshape(B, Lk, n_heads, head_dim).transpose(0, 2, 1, 3)
        energy = jnp.einsum('bhqd,bhkd->bhqk', Q, K) / scale
        energy = jnp.where(mask[:, None, :, :] == 0, -1e10, energy)
        attn = jax.nn.softmax(energy, axis=-1)
        ctx = jnp.einsum('bhqk,bhkd->bhqd', attn, V)
        ctx = ctx.transpose(0, 2, 1, 3).reshape(B, Lq, H)
        return linear(ctx, wo, bo)

    g, b = params["ln_gamma"], params["ln_beta"]
    a = mha(src, src, src, mask, params["self_attn"])
    src = layer_norm(src + a, g, b)
    w1, b1, w2, b2 = params["ffn"]
    f = jnp.maximum(src @ w1.T + b1, 0.0) @ w2.T + b2
    src = layer_norm(src + f, g, b)
    return src


# ---------------------------------------------------------------------------
# Deterministic parameter construction (torch Linear convention: W [out, in])
# ---------------------------------------------------------------------------
def init_params(key, hid_dim, n_heads, pf_dim):
    keys = jax.random.split(key, 6)

    def linear(kw, kb, out_d, in_d):
        w = jax.random.normal(kw, (out_d, in_d), jnp.float32) * 0.1
        b = jax.random.normal(kb, (1, out_d), jnp.float32) * 0.01
        return w, b

    self_keys = jax.random.split(keys[0], 8)
    wq, bq = linear(self_keys[0], self_keys[1], hid_dim, hid_dim)
    wk, bk = linear(self_keys[2], self_keys[3], hid_dim, hid_dim)
    wv, bv = linear(self_keys[4], self_keys[5], hid_dim, hid_dim)
    wo, bo = linear(self_keys[6], self_keys[7], hid_dim, hid_dim)

    w1, b1 = linear(keys[1], keys[2], pf_dim, hid_dim)
    w2, b2 = linear(keys[3], keys[4], hid_dim, pf_dim)

    # Note: the torch EncoderLayer uses ONE shared nn.LayerNorm for both
    # residual branches, so a single (gamma, beta) pair is correct here.
    return {
        "n_heads": n_heads,
        "ln_gamma": jnp.ones((1, hid_dim), jnp.float32),
        "ln_beta": jnp.zeros((1, hid_dim), jnp.float32),
        "self_attn": (wq, bq, wk, bk, wv, bv, wo, bo),
        "ffn": (w1, b1, w2, b2),
    }


# ---------------------------------------------------------------------------
if __name__ == "__main__":
    B, L = 2, 8
    hid_dim, n_heads, pf_dim = 32, 4, 64

    key = jax.random.PRNGKey(0)
    k_src, k_par = jax.random.split(key, 2)

    src = jax.random.normal(k_src, (B, L, hid_dim), jnp.float32)
    # padding-style source mask [B, L, L]: all positions valid
    src_mask = jnp.ones((B, L, L), jnp.int32)

    params = init_params(k_par, hid_dim, n_heads, pf_dim)
    prepped = prepare_params(params)   # one-time: transpose / bf16 cast / scale fold

    out = encoder_layer_forward(src, src_mask, prepped)
    out = jax.block_until_ready(out)

    ref = jax.block_until_ready(reference_encoder_layer(src, src_mask, params))

    assert out.shape == (B, L, hid_dim)
    assert bool(jnp.all(jnp.isfinite(out)))
    # bf16 MXU operands + approximate softmax reciprocal vs. a pure-f32 reference
    max_err = float(jnp.max(jnp.abs(out - ref)))
    assert bool(jnp.allclose(out, ref, rtol=3e-2, atol=3e-2)), max_err
    print("KERNEL_OK")
</pallas_src>

<mosaic_0001>
module attributes {stable_mosaic.version = 11 : i64} {
  func.func @mha_add_ln_kernel(%arg0: i32, %arg1: i32, %arg2: memref<1x8x32xf32, #tpu.memory_space<vmem>>, %arg3: memref<1x8x32xf32, #tpu.memory_space<vmem>>, %arg4: memref<1x8x8xi32, #tpu.memory_space<vmem>>, %arg5: memref<32x32xbf16, #tpu.memory_space<vmem>>, %arg6: memref<1x32xf32, #tpu.memory_space<vmem>>, %arg7: memref<32x32xbf16, #tpu.memory_space<vmem>>, %arg8: memref<1x32xf32, #tpu.memory_space<vmem>>, %arg9: memref<32x32xbf16, #tpu.memory_space<vmem>>, %arg10: memref<1x32xf32, #tpu.memory_space<vmem>>, %arg11: memref<32x32xbf16, #tpu.memory_space<vmem>>, %arg12: memref<1x32xf32, #tpu.memory_space<vmem>>, %arg13: memref<1x32xf32, #tpu.memory_space<vmem>>, %arg14: memref<1x32xf32, #tpu.memory_space<vmem>>, %arg15: memref<1x8x32xf32, #tpu.memory_space<vmem>>, %arg16: memref<4x8x8xbf16, #tpu.memory_space<vmem>>, %arg17: memref<4x8x8xbf16, #tpu.memory_space<vmem>>) attributes {dimension_semantics = [#tpu.dimension_semantics<parallel>, #tpu.dimension_semantics<arbitrary>], iteration_bounds = array<i64: 2, 1>, scalar_prefetch = 0 : i64, scratch_operands = 2 : i64, tpu.core_type = #tpu.core_type<tc>, window_params = [{transform_indices = @transform_0, window_bounds = array<i64: 1, 8, 32>}, {transform_indices = @transform_1, window_bounds = array<i64: 1, 8, 32>}, {transform_indices = @transform_2, window_bounds = array<i64: 1, 8, 8>}, {pipeline_mode = #tpu.pipeline_mode<synchronous>, transform_indices = @transform_3, window_bounds = array<i64: 32, 32>}, {pipeline_mode = #tpu.pipeline_mode<synchronous>, transform_indices = @transform_4, window_bounds = array<i64: 1, 32>}, {pipeline_mode = #tpu.pipeline_mode<synchronous>, transform_indices = @transform_5, window_bounds = array<i64: 32, 32>}, {pipeline_mode = #tpu.pipeline_mode<synchronous>, transform_indices = @transform_6, window_bounds = array<i64: 1, 32>}, {pipeline_mode = #tpu.pipeline_mode<synchronous>, transform_indices = @transform_7, window_bounds = array<i64: 32, 32>}, {pipeline_mode = #tpu.pipeline_mode<synchronous>, transform_indices = @transform_8, window_bounds = array<i64: 1, 32>}, {pipeline_mode = #tpu.pipeline_mode<synchronous>, transform_indices = @transform_9, window_bounds = array<i64: 32, 32>}, {pipeline_mode = #tpu.pipeline_mode<synchronous>, transform_indices = @transform_10, window_bounds = array<i64: 1, 32>}, {pipeline_mode = #tpu.pipeline_mode<synchronous>, transform_indices = @transform_11, window_bounds = array<i64: 1, 32>}, {pipeline_mode = #tpu.pipeline_mode<synchronous>, transform_indices = @transform_12, window_bounds = array<i64: 1, 32>}, {transform_indices = @transform_13, window_bounds = array<i64: 1, 8, 32>}]} {
    %c0_i32 = arith.constant 0 : i32
    %0 = arith.cmpi eq, %arg1, %c0_i32 : i32
    %1 = arith.extui %0 : i1 to i32
    %c0_i32_0 = arith.constant 0 : i32
    %2 = arith.cmpi ne, %1, %c0_i32_0 : i32
    scf.if %2 {
      %c0_43 = arith.constant 0 : index
      %c0_44 = arith.constant 0 : index
      %c0_45 = arith.constant 0 : index
      %77 = vector.load %arg3[%c0_43, %c0_44, %c0_45] : memref<1x8x32xf32, #tpu.memory_space<vmem>>, vector<1x8x32xf32>
      %78 = vector.shape_cast %77 : vector<1x8x32xf32> to vector<8x32xf32>
      %79 = arith.truncf %78 : vector<8x32xf32> to vector<8x32xbf16>
      %c0_46 = arith.constant 0 : index
      %c0_47 = arith.constant 0 : index
      %80 = vector.load %arg7[%c0_46, %c0_47] : memref<32x32xbf16, #tpu.memory_space<vmem>>, vector<32x32xbf16>
      %cst_48 = arith.constant dense<0.000000e+00> : vector<8x32xf32>
      %81 = tpu.matmul %79, %80, %cst_48 {dimension_numbers = #tpu.dot_dimension_numbers<[1], [0], [0], [1], [0, 0, 1, 1], [], []>} : vector<8x32xbf16>, vector<32x32xbf16>, vector<8x32xf32> -> vector<8x32xf32>
      %c0_49 = arith.constant 0 : index
      %c0_50 = arith.constant 0 : index
      %82 = vector.load %arg8[%c0_49, %c0_50] : memref<1x32xf32, #tpu.memory_space<vmem>>, vector<1x32xf32>
      %83 = vector.broadcast %82 : vector<1x32xf32> to vector<8x32xf32>
      %84 = arith.addf %81, %83 : vector<8x32xf32>
      %c0_51 = arith.constant 0 : index
      %c0_52 = arith.constant 0 : index
      %85 = vector.load %arg9[%c0_51, %c0_52] : memref<32x32xbf16, #tpu.memory_space<vmem>>, vector<32x32xbf16>
      %cst_53 = arith.constant dense<0.000000e+00> : vector<8x32xf32>
      %86 = tpu.matmul %79, %85, %cst_53 {dimension_numbers = #tpu.dot_dimension_numbers<[1], [0], [0], [1], [0, 0, 1, 1], [], []>} : vector<8x32xbf16>, vector<32x32xbf16>, vector<8x32xf32> -> vector<8x32xf32>
      %c0_54 = arith.constant 0 : index
      %c0_55 = arith.constant 0 : index
      %87 = vector.load %arg10[%c0_54, %c0_55] : memref<1x32xf32, #tpu.memory_space<vmem>>, vector<1x32xf32>
      %88 = vector.broadcast %87 : vector<1x32xf32> to vector<8x32xf32>
      %89 = arith.addf %86, %88 : vector<8x32xf32>
      %90 = vector.shape_cast %84 : vector<8x32xf32> to vector<8x4x8xf32>
      %91 = tpu.transpose %90, [1, 0, 2] : vector<8x4x8xf32> -> vector<4x8x8xf32>
      %92 = arith.truncf %91 : vector<4x8x8xf32> to vector<4x8x8xbf16>
      %c0_56 = arith.constant 0 : index
      %c0_57 = arith.constant 0 : index
      %c0_58 = arith.constant 0 : index
      %93 = vector.load %arg16[%c0_56, %c0_57, %c0_58] : memref<4x8x8xbf16, #tpu.memory_space<vmem>>, vector<4x8x8xbf16>
      tpu.vector_store %arg16[%c0_56, %c0_57, %c0_58], %92 {strides = array<i32>} : memref<4x8x8xbf16, #tpu.memory_space<vmem>>, vector<4x8x8xbf16>,
      %94 = vector.shape_cast %89 : vector<8x32xf32> to vector<8x4x8xf32>
      %95 = tpu.transpose %94, [1, 0, 2] : vector<8x4x8xf32> -> vector<4x8x8xf32>
      %96 = arith.truncf %95 : vector<4x8x8xf32> to vector<4x8x8xbf16>
      %c0_59 = arith.constant 0 : index
      %c0_60 = arith.constant 0 : index
      %c0_61 = arith.constant 0 : index
      %97 = vector.load %arg17[%c0_59, %c0_60, %c0_61] : memref<4x8x8xbf16, #tpu.memory_space<vmem>>, vector<4x8x8xbf16>
      tpu.vector_store %arg17[%c0_59, %c0_60, %c0_61], %96 {strides = array<i32>} : memref<4x8x8xbf16, #tpu.memory_space<vmem>>, vector<4x8x8xbf16>,
    } else {
    }
    %c0 = arith.constant 0 : index
    %c0_1 = arith.constant 0 : index
    %c0_2 = arith.constant 0 : index
    %3 = vector.load %arg2[%c0, %c0_1, %c0_2] : memref<1x8x32xf32, #tpu.memory_space<vmem>>, vector<1x8x32xf32>
    %4 = vector.shape_cast %3 : vector<1x8x32xf32> to vector<8x32xf32>
    %c0_3 = arith.constant 0 : index
    %c0_4 = arith.constant 0 : index
    %c0_5 = arith.constant 0 : index
    %5 = vector.load %arg2[%c0_3, %c0_4, %c0_5] : memref<1x8x32xf32, #tpu.memory_space<vmem>>, vector<1x8x32xf32>
    %6 = vector.shape_cast %5 : vector<1x8x32xf32> to vector<8x32xf32>
    %7 = arith.truncf %6 : vector<8x32xf32> to vector<8x32xbf16>
    %c0_6 = arith.constant 0 : index
    %c0_7 = arith.constant 0 : index
    %8 = vector.load %arg5[%c0_6, %c0_7] : memref<32x32xbf16, #tpu.memory_space<vmem>>, vector<32x32xbf16>
    %cst = arith.constant dense<0.000000e+00> : vector<8x32xf32>
    %9 = tpu.matmul %7, %8, %cst {dimension_numbers = #tpu.dot_dimension_numbers<[1], [0], [0], [1], [0, 0, 1, 1], [], []>} : vector<8x32xbf16>, vector<32x32xbf16>, vector<8x32xf32> -> vector<8x32xf32>
    %c0_8 = arith.constant 0 : index
    %c0_9 = arith.constant 0 : index
    %10 = vector.load %arg6[%c0_8, %c0_9] : memref<1x32xf32, #tpu.memory_space<vmem>>, vector<1x32xf32>
    %11 = vector.broadcast %10 : vector<1x32xf32> to vector<8x32xf32>
    %12 = arith.addf %9, %11 : vector<8x32xf32>
    %13 = vector.shape_cast %12 : vector<8x32xf32> to vector<8x4x8xf32>
    %14 = tpu.transpose %13, [1, 0, 2] : vector<8x4x8xf32> -> vector<4x8x8xf32>
    %15 = arith.truncf %14 : vector<4x8x8xf32> to vector<4x8x8xbf16>
    %c0_10 = arith.constant 0 : index
    %c0_11 = arith.constant 0 : index
    %c0_12 = arith.constant 0 : index
    %16 = vector.load %arg16[%c0_10, %c0_11, %c0_12] : memref<4x8x8xbf16, #tpu.memory_space<vmem>>, vector<4x8x8xbf16>
    "tpu.trace_start"() <{level = 10 : i32, message = "hqd,hkd->hqk"}> : () -> ()
    %cst_13 = arith.constant dense<0.000000e+00> : vector<4x8x8xf32>
    %17 = tpu.matmul %15, %16, %cst_13 {dimension_numbers = #tpu.dot_dimension_numbers<[2], [2], [1], [1], [0, 0, 0, 1, 1, 1], [0], [0]>} : vector<4x8x8xbf16>, vector<4x8x8xbf16>, vector<4x8x8xf32> -> vector<4x8x8xf32>
    "tpu.trace_stop"() : () -> ()
    %c0_14 = arith.constant 0 : index
    %c0_15 = arith.constant 0 : index
    %c0_16 = arith.constant 0 : index
    %18 = vector.load %arg4[%c0_14, %c0_15, %c0_16] : memref<1x8x8xi32, #tpu.memory_space<vmem>>, vector<1x8x8xi32>
    %19 = vector.shape_cast %18 : vector<1x8x8xi32> to vector<8x8xi32>
    %c0_i32_17 = arith.constant 0 : i32
    %20 = vector.broadcast %c0_i32_17 : i32 to vector<8x8xi32>
    %21 = arith.cmpi eq, %19, %20 : vector<8x8xi32>
    %cst_18 = arith.constant -1.000000e+10 : f32
    %cst_19 = arith.constant 0.000000e+00 : f32
    %22 = vector.broadcast %cst_18 : f32 to vector<8x8xf32>
    %23 = vector.broadcast %cst_19 : f32 to vector<8x8xf32>
    %24 = arith.select %21, %22, %23 : vector<8x8xi1>, vector<8x8xf32>
    %25 = vector.shape_cast %24 : vector<8x8xf32> to vector<1x8x8xf32>
    %26 = vector.broadcast %25 : vector<1x8x8xf32> to vector<4x8x8xf32>
    %27 = arith.addf %17, %26 : vector<4x8x8xf32>
    %cst_20 = arith.constant dense<0xFF800000> : vector<4x8xf32>
    %28 = vector.multi_reduction <maximumf>, %27, %cst_20 [2] : vector<4x8x8xf32> to vector<4x8xf32>
    %29 = vector.shape_cast %28 : vector<4x8xf32> to vector<4x8x1xf32>
    %30 = vector.broadcast %29 : vector<4x8x1xf32> to vector<4x8x8xf32>
    %31 = arith.subf %27, %30 : vector<4x8x8xf32>
    %32 = math.exp %31 : vector<4x8x8xf32>
    %cst_21 = arith.constant dense<0.000000e+00> : vector<4x8xf32>
    %33 = vector.multi_reduction <add>, %32, %cst_21 [2] : vector<4x8x8xf32> to vector<4x8xf32>
    %34 = vector.shape_cast %33 : vector<4x8xf32> to vector<4x8x1xf32>
    %35 = tpu.reciprocal %34 {approx = true} : vector<4x8x1xf32> -> vector<4x8x1xf32>
    %36 = vector.broadcast %35 : vector<4x8x1xf32> to vector<4x8x8xf32>
    %37 = arith.mulf %32, %36 : vector<4x8x8xf32>
    %38 = arith.truncf %37 : vector<4x8x8xf32> to vector<4x8x8xbf16>
    %c0_22 = arith.constant 0 : index
    %c0_23 = arith.constant 0 : index
    %c0_24 = arith.constant 0 : index
    %39 = vector.load %arg17[%c0_22, %c0_23, %c0_24] : memref<4x8x8xbf16, #tpu.memory_space<vmem>>, vector<4x8x8xbf16>
    "tpu.trace_start"() <{level = 10 : i32, message = "hqk,hkd->hqd"}> : () -> ()
    %cst_25 = arith.constant dense<0.000000e+00> : vector<4x8x8xf32>
    %40 = tpu.matmul %38, %39, %cst_25 {dimension_numbers = #tpu.dot_dimension_numbers<[2], [1], [1], [2], [0, 0, 0, 1, 1, 2], [0], [0]>} : vector<4x8x8xbf16>, vector<4x8x8xbf16>, vector<4x8x8xf32> -> vector<4x8x8xf32>
    "tpu.trace_stop"() : () -> ()
    %41 = tpu.transpose %40, [1, 0, 2] : vector<4x8x8xf32> -> vector<8x4x8xf32>
    %42 = vector.shape_cast %41 : vector<8x4x8xf32> to vector<8x32xf32>
    %43 = arith.truncf %42 : vector<8x32xf32> to vector<8x32xbf16>
    %c0_26 = arith.constant 0 : index
    %c0_27 = arith.constant 0 : index
    %44 = vector.load %arg11[%c0_26, %c0_27] : memref<32x32xbf16, #tpu.memory_space<vmem>>, vector<32x32xbf16>
    %cst_28 = arith.constant dense<0.000000e+00> : vector<8x32xf32>
    %45 = tpu.matmul %43, %44, %cst_28 {dimension_numbers = #tpu.dot_dimension_numbers<[1], [0], [0], [1], [0, 0, 1, 1], [], []>} : vector<8x32xbf16>, vector<32x32xbf16>, vector<8x32xf32> -> vector<8x32xf32>
    %c0_29 = arith.constant 0 : index
    %c0_30 = arith.constant 0 : index
    %46 = vector.load %arg12[%c0_29, %c0_30] : memref<1x32xf32, #tpu.memory_space<vmem>>, vector<1x32xf32>
    %47 = vector.broadcast %46 : vector<1x32xf32> to vector<8x32xf32>
    %48 = arith.addf %45, %47 : vector<8x32xf32>
    %49 = arith.addf %4, %48 : vector<8x32xf32>
    %cst_31 = arith.constant dense<0.000000e+00> : vector<8xf32>
    %50 = vector.multi_reduction <add>, %49, %cst_31 [1] : vector<8x32xf32> to vector<8xf32>
    %51 = vector.shape_cast %50 : vector<8xf32> to vector<8x1xf32>
    %cst_32 = arith.constant 3.200000e+01 : f32
    %52 = vector.broadcast %cst_32 : f32 to vector<8x1xf32>
    %53 = arith.divf %51, %52 : vector<8x1xf32>
    %54 = vector.broadcast %53 : vector<8x1xf32> to vector<8x32xf32>
    %55 = arith.subf %49, %54 : vector<8x32xf32>
    %56 = arith.mulf %55, %55 : vector<8x32xf32>
    %cst_33 = arith.constant dense<0.000000e+00> : vector<8xf32>
    %57 = vector.multi_reduction <add>, %56, %cst_33 [1] : vector<8x32xf32> to vector<8xf32>
    %58 = vector.shape_cast %57 : vector<8xf32> to vector<8x1xf32>
    %cst_34 = arith.constant 3.200000e+01 : f32
    %59 = vector.broadcast %cst_34 : f32 to vector<8x1xf32>
    %60 = arith.divf %58, %59 : vector<8x1xf32>
    %61 = vector.broadcast %53 : vector<8x1xf32> to vector<8x32xf32>
    %62 = arith.subf %49, %61 : vector<8x32xf32>
    %cst_35 = arith.constant 9.99999974E-6 : f32
    %63 = vector.broadcast %cst_35 : f32 to vector<8x1xf32>
    %64 = arith.addf %60, %63 : vector<8x1xf32>
    %65 = math.rsqrt %64 : vector<8x1xf32>
    %66 = vector.broadcast %65 : vector<8x1xf32> to vector<8x32xf32>
    %67 = arith.mulf %62, %66 : vector<8x32xf32>
    %c0_36 = arith.constant 0 : index
    %c0_37 = arith.constant 0 : index
    %68 = vector.load %arg13[%c0_36, %c0_37] : memref<1x32xf32, #tpu.memory_space<vmem>>, vector<1x32xf32>
    %69 = vector.broadcast %68 : vector<1x32xf32> to vector<8x32xf32>
    %70 = arith.mulf %67, %69 : vector<8x32xf32>
    %c0_38 = arith.constant 0 : index
    %c0_39 = arith.constant 0 : index
    %71 = vector.load %arg14[%c0_38, %c0_39] : memref<1x32xf32, #tpu.memory_space<vmem>>, vector<1x32xf32>
    %72 = vector.broadcast %71 : vector<1x32xf32> to vector<8x32xf32>
    %73 = arith.addf %70, %72 : vector<8x32xf32>
    %c0_40 = arith.constant 0 : index
    %c0_41 = arith.constant 0 : index
    %c0_42 = arith.constant 0 : index
    %74 = vector.load %arg15[%c0_40, %c0_41, %c0_42] : memref<1x8x32xf32, #tpu.memory_space<vmem>>, vector<1x8x32xf32>
    %75 = vector.shape_cast %74 : vector<1x8x32xf32> to vector<8x32xf32>
    %76 = vector.shape_cast %73 : vector<8x32xf32> to vector<1x8x32xf32>
    tpu.vector_store %arg15[%c0_40, %c0_41, %c0_42], %76 {strides = array<i32>} : memref<1x8x32xf32, #tpu.memory_space<vmem>>, vector<1x8x32xf32>,
    return
  }
  func.func @transform_0(%arg0: i32, %arg1: i32) -> (i32, i32, i32) {
    %c0_i32 = arith.constant 0 : i32
    %c0_i32_0 = arith.constant 0 : i32
    return %arg0, %arg1, %c0_i32 : i32, i32, i32
  }
  func.func @transform_1(%arg0: i32, %arg1: i32) -> (i32, i32, i32) {
    %c0_i32 = arith.constant 0 : i32
    %c0_i32_0 = arith.constant 0 : i32
    %c0_i32_1 = arith.constant 0 : i32
    return %arg0, %c0_i32, %c0_i32_0 : i32, i32, i32
  }
  func.func @transform_2(%arg0: i32, %arg1: i32) -> (i32, i32, i32) {
    %c0_i32 = arith.constant 0 : i32
    %c0_i32_0 = arith.constant 0 : i32
    return %arg0, %arg1, %c0_i32 : i32, i32, i32
  }
  func.func @transform_3(%arg0: i32, %arg1: i32) -> (i32, i32) {
    %c0_i32 = arith.constant 0 : i32
    %c0_i32_0 = arith.constant 0 : i32
    %c0_i32_1 = arith.constant 0 : i32
    return %c0_i32, %c0_i32_0 : i32, i32
  }
  func.func @transform_4(%arg0: i32, %arg1: i32) -> (i32, i32) {
    %c0_i32 = arith.constant 0 : i32
    %c0_i32_0 = arith.constant 0 : i32
    %c0_i32_1 = arith.constant 0 : i32
    return %c0_i32, %c0_i32_0 : i32, i32
  }
  func.func @transform_5(%arg0: i32, %arg1: i32) -> (i32, i32) {
    %c0_i32 = arith.constant 0 : i32
    %c0_i32_0 = arith.constant 0 : i32
    %c0_i32_1 = arith.constant 0 : i32
    return %c0_i32, %c0_i32_0 : i32, i32
  }
  func.func @transform_6(%arg0: i32, %arg1: i32) -> (i32, i32) {
    %c0_i32 = arith.constant 0 : i32
    %c0_i32_0 = arith.constant 0 : i32
    %c0_i32_1 = arith.constant 0 : i32
    return %c0_i32, %c0_i32_0 : i32, i32
  }
  func.func @transform_7(%arg0: i32, %arg1: i32) -> (i32, i32) {
    %c0_i32 = arith.constant 0 : i32
    %c0_i32_0 = arith.constant 0 : i32
    %c0_i32_1 = arith.constant 0 : i32
    return %c0_i32, %c0_i32_0 : i32, i32
  }
  func.func @transform_8(%arg0: i32, %arg1: i32) -> (i32, i32) {
    %c0_i32 = arith.constant 0 : i32
    %c0_i32_0 = arith.constant 0 : i32
    %c0_i32_1 = arith.constant 0 : i32
    return %c0_i32, %c0_i32_0 : i32, i32
  }
  func.func @transform_9(%arg0: i32, %arg1: i32) -> (i32, i32) {
    %c0_i32 = arith.constant 0 : i32
    %c0_i32_0 = arith.constant 0 : i32
    %c0_i32_1 = arith.constant 0 : i32
    return %c0_i32, %c0_i32_0 : i32, i32
  }
  func.func @transform_10(%arg0: i32, %arg1: i32) -> (i32, i32) {
    %c0_i32 = arith.constant 0 : i32
    %c0_i32_0 = arith.constant 0 : i32
    %c0_i32_1 = arith.constant 0 : i32
    return %c0_i32, %c0_i32_0 : i32, i32
  }
  func.func @transform_11(%arg0: i32, %arg1: i32) -> (i32, i32) {
    %c0_i32 = arith.constant 0 : i32
    %c0_i32_0 = arith.constant 0 : i32
    %c0_i32_1 = arith.constant 0 : i32
    return %c0_i32, %c0_i32_0 : i32, i32
  }
  func.func @transform_12(%arg0: i32, %arg1: i32) -> (i32, i32) {
    %c0_i32 = arith.constant 0 : i32
    %c0_i32_0 = arith.constant 0 : i32
    %c0_i32_1 = arith.constant 0 : i32
    return %c0_i32, %c0_i32_0 : i32, i32
  }
  func.func @transform_13(%arg0: i32, %arg1: i32) -> (i32, i32, i32) {
    %c0_i32 = arith.constant 0 : i32
    %c0_i32_0 = arith.constant 0 : i32
    return %arg0, %arg1, %c0_i32 : i32, i32, i32
  }
}

</mosaic_0001>

<bundles_post_ra>
// kernel: tpu_custom_call.1
= control target key start
LH: loop header
LB: loop body
LE: loop exit
PB: predicated region body
PF: predicated region fallthrough
CT: control target
= control target key end

     0   :  { %s3402_s0 = inlined_call_operand.hbm [shape: f32[2,8,32], index: 0, kind: input, shape index: {}]   ;;  %s3403_s1 = inlined_call_operand.hbm [shape: f32[2,8,32], index: 1, kind: input, shape index: {}]   ;;  %s3404_s2 = inlined_call_operand.hbm [shape: s32[2,8,8], index: 2, kind: input, shape index: {}]   ;;  %s3405_s3 = inlined_call_operand.hbm [shape: bf16[32,32], index: 3, kind: input, shape index: {}]   ;;  %s3406_s4 = inlined_call_operand.hbm [shape: f32[1,32], index: 4, kind: input, shape index: {}]   ;;  %s3407_s5 = inlined_call_operand.hbm [shape: bf16[32,32], index: 5, kind: input, shape index: {}]   ;;  %s3408_s6 = inlined_call_operand.hbm [shape: f32[1,32], index: 6, kind: input, shape index: {}]   ;;  %s3409_s7 = inlined_call_operand.hbm [shape: bf16[32,32], index: 7, kind: input, shape index: {}]   ;;  %s3410_s8 = inlined_call_operand.hbm [shape: f32[1,32], index: 8, kind: input, shape index: {}]   ;;  %s3411_s9 = inlined_call_operand.vmem [shape: bf16[32,32], index: 9, kind: input, shape index: {}]   ;;  %s3412_s10 = inlined_call_operand.vmem [shape: f32[1,32], index: 10, kind: input, shape index: {}]   ;;  %s3413_s11 = inlined_call_operand.vmem [shape: f32[1,32], index: 11, kind: input, shape index: {}]   ;;  %s3414_s12 = inlined_call_operand.vmem [shape: f32[1,32], index: 12, kind: input, shape index: {}]   ;;  %s3415_s13 = inlined_call_operand.hbm [shape: f32[2,8,32], index: 13, kind: output, shape index: {}]  }
   0x1   :  { %3433 = sst [smem:[#allocation33_spill]] %s3405_s3 }
   0x2   :  { %3434 = sst [smem:[#allocation34_spill]] %s3407_s5 }
   0x3   :  { %3435 = sst [smem:[#allocation35_spill]] %s3409_s7 }
   0x4   :  { %3436 = sst [smem:[#allocation36_spill]] %s3413_s11 }
   0x5   :  { %3437 = sst [smem:[#allocation37_spill]] %s3414_s12 }
   0x6   :  { %3438 = sst [smem:[#allocation38_spill]] %s3415_s13 }
   0x7   :  { %18 = vsyncpa [#allocation5], 0 }
   0x8   :  { %20 = vsyncpa [#allocation5 + $0x1], 0 }
   0x9   :  { %21 = vsyncpa [#allocation8], 0 }
   0xa   :  { %23 = vsyncpa [#allocation8 + $0x1], 0 }
   0xb   :  { %24 = vsyncpa [#allocation11], 0 }
   0xc   :  { %25 = vsyncpa [#allocation14], 0 }
   0xd   :  { %26 = vsyncpa [#allocation17], 0 }
   0xe   :  { %27 = vsyncpa [#allocation6], 0 }
   0xf   :  { %29 = vsyncpa [#allocation6 + $0x1], 0  ;;  %s2944_s25 = smov 0   ;;  %s2946_s26 = smov 0  }
  0x10   :  { %s2948_s27 = smov 0   ;;  %s2950_s28 = smov 0  }
  0x11   :  { %s2952_s29 = smov 0   ;;  %s2954_s30 = smov 0  }
  0x12 LB: > { %3439 = sst [smem:[#allocation26_spill]] %s2830_s25  ;;  %s2975_s14 = sadd.s32 4294967295, %s2850_s30   ;;  %s2850_s30 = sphi %s2954_s30, %s35_s30   ;;  %s2846_s29 = sphi %s2952_s29, %s3482_s29   ;;  %s2842_s28 = sphi %s2950_s28, %s3481_s28   ;;  %s2838_s27 = sphi %s2948_s27, %s3485_s27   ;;  %s2834_s26 = sphi %s2946_s26, %s3484_s26   ;;  %s2830_s25 = sphi %s2944_s25, %s3483_s25  }
  0x13   : > { %3440 = sst [smem:[#allocation27_spill]] %s2846_s29  ;;  %p2172_p0 = scmp.ge.s32.totalorder %s2850_s30, 1 }
  0x14   : > { %3441 = sst [smem:[#allocation28_spill]] %s2850_s30  ;;  %p3417_p1 = scmp.eq.s32.totalorder %s2975_s14, 0 }
  0x15   : > { %p372_p2 = scmp.lt.s32.totalorder %s2850_s30, 3  ;;  %s2852_s16 = smov [#allocation10]  }
  0x16   : > { %s384_s17 = sshll.u32 %s2852_s16, 4  ;;  %s2853_s19 = smov [#allocation13]   ;;  %s385_s17 = int_to_ptr.vmem [resolvable:$true] %s384_s17 }
  0x17   : > { %p2980_p3 = pnand %p2172_p0, %p372_p2  ;;  %s408_s20 = sshll.u32 %s2853_s19, 4  ;;  %s409_s20 = int_to_ptr.vmem [resolvable:$true] %s408_s20 }
  0x18   : > { %s2854_s21 = smov [#allocation16]   ;;  %s2525_s24 = scalar_lea.vmem %s385_s17, 256 }
  0x19   : > { %s3442_s15 = scalar_select %p2980_p3, 1, 0 }
  0x1a   : > { %p2375_p4 = pneg %p2980_p3  ;;  %s432_s22 = sshll.u32 %s2854_s21, 4  ;;  %s433_s22 = int_to_ptr.vmem [resolvable:$true] %s432_s22 }
  0x1b   : > { %p2526_p8 = scmp.ne.s32.totalorder %s385_s17, %s2525_s24  ;;  %p2533_p11 = scmp.lt.s32.totalorder %s385_s17, %s385_s17 }
  0x1c   : > { %p2989_p6 = pnand %p2375_p4, %p3417_p1  ;;  %p2534_p12 = scmp.lt.s32.totalorder %s2525_s24, %s2525_s24 }
  0x1e   : > { %s3443_s18 = scalar_select %p2989_p6, 1, 0 }
  0x1f   : > { %p2995_p7 = pneg %p2989_p6  ;;  %p2535_p13 = por %p2534_p12, %p2533_p11 }
  0x21   : > { %p2528_p9 = pnand %p2526_p8, %p2995_p7 }
  0x23   : > { %p2529_p10 = pneg %p2528_p9 }
  0x25   : > { %p2536_p0 = pnand %p2535_p13, %p2529_p10 }
  0x27   : > { %2539 = shalt.err (!%p2536_p0)
}
  0x28   : > { %s2855_s16 = smov 64   ;;  %s2856_s19 = smov 4  }
  0x29   : > { %s3445_s3 = sld [smem:[#allocation33_spill]]  ;;  %s2551_s12 = scalar_lea.vmem %s409_s20, 256 }
  0x2a   : > { %p2552_p2 = scmp.ne.s32.totalorder %s409_s20, %s2551_s12  ;;  %p2559_p9 = scmp.lt.s32.totalorder %s409_s20, %s409_s20 }
  0x2b   : > { %p2560_p5 = scmp.lt.s32.totalorder %s2551_s12, %s2551_s12 }
  0x2c   : > { %p2554_p4 = pnand %p2552_p2, %p2995_p7 }
  0x2d   : > { %p2561_p1 = por %p2560_p5, %p2559_p9 }
  0x2e   : > { %p2555_p8 = pneg %p2554_p4 }
  0x2f   : > { %2378 = dma.hbm_to_vmem [thread:$0]  (!%p2989_p6), %s3445_s3, 256, %s385_s17, [#allocation11], %s2855_s16, %s2855_s16, %s2856_s19  }
  0x30   : > { %p2562_p11 = pnand %p2561_p1, %p2555_p8 }
  0x32   : > { %2565 = shalt.err (!%p2562_p11)
}
  0x33   : > { %s3446_s5 = sld [smem:[#allocation34_spill]]  ;;  %s2577_s13 = scalar_lea.vmem %s433_s22, 256 }
  0x34   : > { %p2578_p10 = scmp.ne.s32.totalorder %s433_s22, %s2577_s13  ;;  %p2585_p0 = scmp.lt.s32.totalorder %s433_s22, %s433_s22 }
  0x35   : > { %p2586_p2 = scmp.lt.s32.totalorder %s2577_s13, %s2577_s13 }
  0x36   : > { %p2580_p12 = pnand %p2578_p10, %p2995_p7 }
  0x37   : > { %p2587_p4 = por %p2586_p2, %p2585_p0 }
  0x38   : > { %p2581_p13 = pneg %p2580_p12 }
  0x39   : > { %2384 = dma.hbm_to_vmem [thread:$0]  (!%p2989_p6), %s3446_s5, 256, %s409_s20, [#allocation14], %s2855_s16, %s2855_s16, %s2856_s19  }
  0x3a   : > { %p2588_p3 = pnand %p2587_p4, %p2581_p13 }
  0x3c   : > { %2591 = shalt.err (!%p2588_p3)
}
  0x3d   : > { %s3447_s7 = sld [smem:[#allocation35_spill]]  ;;  %s2171_s11 = sadd.s32 4294967294, %s2850_s30  }
  0x3e   : > { %s47_s20 = sadd.s32 1, %s2846_s29  ;;  %s56_s21 = sadd.s32 1, %s2838_s27 }
  0x3f   : > { %p49_p1 = scmp.ge.s32.totalorder %s47_s20, 2  ;;  %p63_p3 = scmp.ne.s32.totalorder %s2838_s27, %s2834_s26 }
  0x40   : > { %p64_p5 = scmp.eq.s32.totalorder %s2850_s30, 0  ;;  %p69_p8 = scmp.ne.s32.totalorder %s2834_s26, %s2830_s25 }
  0x41   : > { %s3487_s20 = smov (%p49_p1, %s47_s20), 0  ;;  %p3450_p11 = scmp.eq.s32.totalorder %s2975_s14, 0 }
  0x42   : > { %3448 = sst [smem:[#allocation29_spill]] %s3487_s20  ;;  %p3030_p9 = por %p64_p5, %p63_p3 }
  0x43   : > { %2390 = dma.hbm_to_vmem [thread:$0]  (!%p2989_p6), %s3447_s7, 256, %s433_s22, [#allocation17], %s2855_s16, %s2855_s16, %s2856_s19  }
  0x44   : > { %p3036_p10 = por %p3450_p11, %p69_p8  ;;  %s51_s16 = ssub.s32 %s2846_s29, %s3487_s20 }
  0x45   : > { %p359_p12 = scmp.eq.s32.totalorder %s2975_s14, 1  ;;  %p54_p13 = scmp.eq.s32.totalorder %s51_s16, 0 }
  0x46   : > { %s3451_s22 = scalar_select %p3036_p10, 1, 0 }
  0x47   : > { %p365_p0 = scmp.eq.s32.totalorder %s2171_s11, 1  ;;  %p3043_p2 = por %p359_p12, %p63_p3 }
  0x48   : > { %p2414_p4 = scmp.lt.s32.totalorder %s2850_s30, 2  ;;  %s3421_s17 = sand.u32 1, %s2838_s27  }
  0x49   : > { %s3452_s19 = scalar_select %p3043_p2, 1, 0 }
  0x4a   : > { %s3049_s13 = scalar_select %p54_p13, %s2838_s27, %s56_s21  }
  0x4b   : > { %3453 = sst [smem:[#allocation30_spill]] %s3452_s19  ;;  %p3051_p1 = por %p365_p0, %p69_p8 }
  0x4c   : > { %3454 = sst [smem:[#allocation31_spill]] %s3049_s13  ;;  %s3058_s3 = sshll.u32 %s3421_s17, 3 }
  0x4d   : > { %s3455_s12 = scalar_select %p3051_p1, 1, 0 }
  0x4e   : > { %s3061_s5 = sshll.u32 %s2846_s29, 7  ;;  %p3065_p3 = pnand %p2414_p4, %p3030_p9 }
  0x4f   : > { %3456 = sst [smem:[#allocation32_spill]] %s3455_s12  ;;  %s488_s21 = sand.u32 1, %s2850_s30  }
  0x50   : > { %s497_s20 = scalar_lea.hbm %s3403_s1, %s3061_s5  ;;  %s492_s13 = scalar_lea.vmem [#allocation7], %s3058_s3 }
  0x51   : > { %s499_s12 = sshll.u32 %s492_s13, 4  ;;  %s2857_s17 = smov [#allocation12]   ;;  %s500_s12 = int_to_ptr.vmem [resolvable:$true] %s499_s12 }
  0x52   : > { %s398_s25 = sshll.u32 %s2857_s17, 4  ;;  %s3075_s29 = scalar_lea.sflag [#allocation8], %s488_s21  ;;  %s399_s25 = int_to_ptr.vmem [resolvable:$true] %s398_s25 }
  0x53   : > { %p3428_p5 = pneg %p3065_p3  ;;  %s2605_s24 = scalar_lea.vmem %s500_s12, 128 }
  0x54   : > { %p2606_p8 = scmp.ne.s32.totalorder %s500_s12, %s2605_s24  ;;  %s2858_s30 = smov [#allocation7]  }
  0x55   : > { %s2610_s19 = sshll.u32 %s2858_s30, 4  ;;  %s2611_s19 = int_to_ptr.vmem [resolvable:$false] %s2610_s19 }
  0x56   : > { %p2608_p9 = pnand %p2606_p8, %p3428_p5  ;;  %s2612_s7 = scalar_lea.vmem %s2611_s19, 256 }
  0x57   : > { %p2613_p12 = scmp.lt.s32.totalorder %s500_s12, %s2611_s19  ;;  %p2614_p13 = scmp.lt.s32.totalorder %s2612_s7, %s2605_s24 }
  0x58   : > { %p2609_p11 = pneg %p2608_p9 }
  0x59   : > { %p2615_p0 = por %p2614_p13, %p2613_p12 }
  0x5b   : > { %p2616_p4 = pnand %p2615_p0, %p2609_p11 }
  0x5d   : > { %2619 = shalt.err (!%p2616_p4)
}
  0x5e   : > { %2400 = dma.hbm_to_vmem [thread:$0]  (!%p3065_p3), %s497_s20, 128, %s500_s12, %s3075_s29  }
  0x5f   : > { %s2631_s13 = scalar_lea.vmem %s399_s25, 16  ;;  %s2638_s17 = scalar_lea.vmem %s399_s25, 32 }
  0x60   : > { %p2632_p1 = scmp.ne.s32.totalorder %s399_s25, %s2631_s13  ;;  %p2639_p5 = scmp.lt.s32.totalorder %s399_s25, %s399_s25 }
  0x61   : > { %p2640_p2 = scmp.lt.s32.totalorder %s2638_s17, %s2631_s13 }
  0x62   : > { %p2634_p8 = pnand %p2632_p1, %p2995_p7 }
  0x63   : > { %p2641_p10 = por %p2640_p2, %p2639_p5 }
  0x64   : > { %p2635_p9 = pneg %p2634_p8 }
  0x66   : > { %p2642_p6 = pnand %p2641_p10, %p2635_p9 }
  0x68   : > { %2645 = shalt.err (!%p2642_p6)
}
  0x69   : > { %p3458_p11 = scmp.ne.s32.totalorder %s3443_s18, 0  ;;  %s2859_s20 = smov [#allocation15]  }
  0x6a   : > { %s422_s12 = sshll.u32 %s2859_s20, 4  ;;  %s2860_s21 = smov [#allocation18]   ;;  %s423_s12 = int_to_ptr.vmem [resolvable:$true] %s422_s12 }
  0x6b   : > { %2381 = dma.hbm_to_vmem [thread:$0]  (!%p3458_p11), %s3406_s4, 16, %s399_s25, [#allocation11]  }
  0x6c   : > { %s446_s16 = sshll.u32 %s2860_s21, 4  ;;  %s2657_s24 = scalar_lea.vmem %s423_s12, 16  ;;  %s447_s16 = int_to_ptr.vmem [resolvable:$true] %s446_s16 }
  0x6d   : > { %p2658_p1 = scmp.ne.s32.totalorder %s423_s12, %s2657_s24  ;;  %s2664_s7 = scalar_lea.vmem %s423_s12, 32 }
  0x6e   : > { %p2665_p10 = scmp.lt.s32.totalorder %s423_s12, %s423_s12  ;;  %p2666_p6 = scmp.lt.s32.totalorder %s2664_s7, %s2657_s24 }
  0x6f   : > { %p2660_p12 = pnand %p2658_p1, %p2995_p7 }
  0x70   : > { %p2667_p2 = por %p2666_p6, %p2665_p10 }
  0x71   : > { %p2661_p13 = pneg %p2660_p12 }
  0x73   : > { %p2668_p5 = pnand %p2667_p2, %p2661_p13 }
  0x75   : > { %2671 = shalt.err (!%p2668_p5)
}
  0x76   : > { %2387 = dma.hbm_to_vmem [thread:$0]  (!%p3458_p11), %s3408_s6, 16, %s423_s12, [#allocation14]  }
  0x77   : > { %s2683_s17 = scalar_lea.vmem %s447_s16, 16  ;;  %s2690_s30 = scalar_lea.vmem %s447_s16, 32 }
  0x78   : > { %p2684_p0 = scmp.ne.s32.totalorder %s447_s16, %s2683_s17  ;;  %p2691_p9 = scmp.lt.s32.totalorder %s447_s16, %s447_s16 }
  0x79   : > { %p2692_p1 = scmp.lt.s32.totalorder %s2690_s30, %s2683_s17 }
  0x7a   : > { %p2686_p4 = pnand %p2684_p0, %p2995_p7 }
  0x7b   : > { %p2693_p12 = por %p2692_p1, %p2691_p9 }
  0x7c   : > { %p2687_p8 = pneg %p2686_p4 }
  0x7e   : > { %p2694_p10 = pnand %p2693_p12, %p2687_p8 }
  0x80   : > { %2697 = shalt.err (!%p2694_p10)
}
  0x81   : > { %2393 = dma.hbm_to_vmem [thread:$0]  (!%p3458_p11), %s3410_s8, 16, %s447_s16, [#allocation17]  }
  0x82   : > { %s479_s21 = scalar_lea.hbm %s3402_s0, %s3061_s5  ;;  %s473_s24 = scalar_lea.vmem [#allocation4], %s3058_s3 }
  0x83   : > { %s481_s7 = sshll.u32 %s473_s24, 4  ;;  %s516_s18 = scalar_lea.hbm %s3404_s2, %s3061_s5  ;;  %s482_s7 = int_to_ptr.vmem [resolvable:$true] %s481_s7 }
  0x84   : > { %s3459_s17 = sand.u32 1, %s2838_s27   ;;  %s2711_s19 = scalar_lea.vmem %s482_s7, 128 }
  0x85   : > { %s470_s30 = scalar_lea.sflag [#allocation5], %s3459_s17  ;;  %p2712_p7 = scmp.ne.s32.totalorder %s482_s7, %s2711_s19 }
  0x86   : > { %p3460_p13 = pneg %p3065_p3  ;;  %s2861_s16 = smov [#allocation4]  }
  0x87   : > { %s2716_s20 = sshll.u32 %s2861_s16, 4  ;;  %s2717_s20 = int_to_ptr.vmem [resolvable:$false] %s2716_s20 }
  0x88   : > { %p2714_p6 = pnand %p2712_p7, %p3460_p13  ;;  %s2718_s23 = scalar_lea.vmem %s2717_s20, 256 }
  0x89   : > { %p2719_p11 = scmp.lt.s32.totalorder %s482_s7, %s2717_s20  ;;  %p2720_p5 = scmp.lt.s32.totalorder %s2718_s23, %s2711_s19 }
  0x8a   : > { %p2715_p2 = pneg %p2714_p6 }
  0x8b   : > { %p2721_p0 = por %p2720_p5, %p2719_p11 }
  0x8d   : > { %p2722_p4 = pnand %p2721_p0, %p2715_p2 }
  0x8f   : > { %2725 = shalt.err (!%p2722_p4)
}
  0x90   : > { %2397 = dma.hbm_to_vmem [thread:$0]  (!%p3065_p3), %s479_s21, 128, %s482_s7, %s470_s30  }
  0x91   : > { %s510_s12 = scalar_lea.vmem [#allocation9], %s3058_s3  ;;  %p3461_p9 = pmov %p3460_p13 }
  0x92   : > { %s518_s24 = sshll.u32 %s510_s12, 4  ;;  %s2862_s25 = smov [#allocation9]   ;;  %s519_s24 = int_to_ptr.vmem [resolvable:$true] %s518_s24 }
  0x93   : > { %s2739_s13 = scalar_lea.vmem %s519_s24, 128  ;;  %s2744_s17 = sshll.u32 %s2862_s25, 4  ;;  %s2745_s17 = int_to_ptr.vmem [resolvable:$false] %s2744_s17 }
  0x94   : > { %p2740_p8 = scmp.ne.s32.totalorder %s519_s24, %s2739_s13  ;;  %s2746_s19 = scalar_lea.vmem %s2745_s17, 256 }
  0x95   : > { %p2747_p10 = scmp.lt.s32.totalorder %s519_s24, %s2745_s17  ;;  %p2748_p7 = scmp.lt.s32.totalorder %s2746_s19, %s2739_s13 }
  0x96   : > { %p2742_p1 = pnand %p2740_p8, %p3461_p9 }
  0x97   : > { %p2749_p13 = por %p2748_p7, %p2747_p10 }
  0x98   : > { %p2743_p12 = pneg %p2742_p1 }
  0x9a   : > { %p2750_p6 = pnand %p2749_p13, %p2743_p12 }
  0x9c   : > { %2753 = shalt.err (!%p2750_p6)
}
  0x9d   : > { %2403 = dma.hbm_to_vmem [thread:$0]  (!%p3065_p3), %s516_s18, 128, %s519_s24, %s3075_s29  }
  0x9e   : > { %p3462_p2 = scmp.ne.s32.totalorder %s3442_s15, 0 }
  0x9f   : > { %s3137_s7 = sand.u32 (!%p3462_p2), 1, %s2834_s26   ;;  %p3463_p11 = scmp.ne.s32.totalorder (!%p3462_p2), %s3451_s22, 0 }
  0xa0   : > { %527 = sbr.rel (%p3462_p2) target bundleno = 1911 (0x777), region = 72  ;;  %s3140_s30 = sshll.u32 (!%p3462_p2), %s3137_s7, 3 }
  0xa1   : > { %s530_s11 = scalar_lea.sflag (!%p3462_p2), [#allocation5], %s3137_s7  ;;  %s533_s16 = scalar_lea.vmem (!%p3462_p2), [#allocation4], %s3140_s30 }
  0xa5   : > { %2805 = dma.done.wait (%p3463_p11), %s530_s11, 128  }
  0xa6   : > { %2807 = vsyncadd (%p3463_p11), %s530_s11, 4294967168  ;;  %s538_s5 = sand.u32 1, %s2975_s14   ;;  %s542_s15 = scalar_lea.vmem [#allocation7], %s3140_s30 }
  0xa7   : > { %s539_s29 = scalar_lea.sflag [#allocation8], %s538_s5 }
  0xa8   : > { %2809 = dma.done.wait (%p3463_p11), %s539_s29, 256  }
  0xa9   : > { %2811 = vsyncadd (%p3463_p11), %s539_s29, 4294967040  ;;  %s551_s18 = scalar_lea.vmem [#allocation9], %s3140_s30  ;;  %p3464_p3 = scmp.eq.s32.totalorder %s2975_s14, 0 }
  0xab   : > { %2813 = dma.done.wait (%p3464_p3), [#allocation11], 272   ;;  %p3465_p5 = pmov %p3464_p3 }
  0xac   : > { %p3466_p0 = pmov %p3464_p3 }
  0xad   : > { %2815 = vsyncadd (%p3465_p5), [#allocation11], 4294967024 }
  0xae   : > { %2817 = dma.done.wait (%p3466_p0), [#allocation14], 272   ;;  %p3467_p4 = pmov %p3466_p0 }
  0xaf   : > { %p3468_p8 = pmov %p3466_p0 }
  0xb0   : > { %2819 = vsyncadd (%p3467_p4), [#allocation14], 4294967024 }
  0xb1   : > { %2821 = dma.done.wait (%p3468_p8), [#allocation17], 272   ;;  %p3469_p9 = pmov %p3466_p0 }
  0xb2   : > { %v2863_v0 = vmov 0.0   ;;  %vm2864_vm0 = vmmov 0   ;;  %v2488_v1 = vld [vmem:[#allocation13 + $0x8] sm:$0xff]   ;;  %v2489_v2 = vld [vmem:[#allocation13] sm:$0xff]   ;;  %vm658_vm1 = vcmask 261120   ;;  %v2490_v4 = vld [vmem:[#allocation10 + $0x8] sm:$0xff]   ;;  %v780_v25 = vlaneseq }
  0xb3   : > { %2823 = vsyncadd (%p3469_p9), [#allocation17], 4294967024  ;;  %2263 = vmatprep.subr.bf16.mxu0 %v2863_v0  ;;  %2267 = vmatprep.mubr.msk.bf16.mxu0 %vm2864_vm0, %v2863_v0  ;;  %v633_v3 = vld [vmem:[%s542_s15] sm:$0xff]  ;;  %v3180_v7 = vld [vmem:[%s533_s16] sm:$0xff]  ;;  %s2865_s14 = smov 104   ;;  %s2866_s22 = smov 120  }
  0xb4   : > { %2271 = vmatprep.subr.bf16.mxu1 %v2863_v0  ;;  %2275 = vmatprep.mubr.msk.bf16.mxu1 %vm2864_vm0, %v2863_v0  ;;  %v634_v5 = vpack.c.bf16 %v633_v3, %v633_v3  ;;  %v2491_v6 = vld [vmem:[#allocation10] sm:$0xff]   ;;  %v1075_v8 = vpack.c.bf16 %v3180_v7, %v3180_v7  ;;  %v2209_v15 = vld [vmem:[#allocation12] ss:$0 sm:$0xff]  ;;  %s2867_s20 = smov 112   ;;  %v2868_v23 = vmov 1983009808  }
  0xb5   : > { %2264 = vmatpush3.bf16.msra.mxu0 %v2488_v1  ;;  %v2197_v9 = vld [vmem:[#allocation15] ss:$0 sm:$0xff]  ;;  %v2492_v17 = vld [vmem:[#allocation16 + $0x8] sm:$0xff]   ;;  %v2493_v21 = vld [vmem:[#allocation16] sm:$0xff]   ;;  %v778_v24 = vunpack.c.l.s4 %v2868_v23  ;;  %v2869_v26 = vmov 1934713408  }
  0xb6   : > { %2265 = vmatprep.subr.bf16.mxu0 %v2863_v0  ;;  %2272 = vmatpush3.bf16.msra.mxu1 %v2492_v17  ;;  %v810_v27 = vunpack.c.l.s4 %v2869_v26  ;;  %v781_v29 = vshrl.u32 %v780_v25, 7  ;;  %vm915_vm2 = vcmask 60416   ;;  %vm1300_vm3 = vcmask 64512   ;;  %s2870_s25 = smov 16   ;;  %s2871_s17 = smov 8  }
  0xb7   : > { %2273 = vmatprep.subr.bf16.mxu1 %v2863_v0  ;;  %v779_v28 = vunpack.c.0.s8 %v778_v24  ;;  %vm1540_vm5 = vcmask 1043456   ;;  %s2872_s19 = smov 24   ;;  %vm1871_vm6 = vcmask 130048   ;;  %vm1873_vm7 = vcmask 195584   ;;  %s3470_s11 = sld [smem:[#allocation30_spill]] }
  0xb8   : > { %v811_v32 = vunpack.c.0.s8 %v810_v27  ;;  %s3471_s29 = sld [smem:[#allocation36_spill]]  ;;  %s2873_s3 = smov [#allocation19]  }
  0xb9   : > { %2266 = vmatpush3.bf16.msra.mxu0 %v2489_v2  ;;  %v3200_v33 = vsub.s32 %v779_v28, %v781_v29  ;;  %s3473_s13 = sld [smem:[#allocation38_spill]]  ;;  %s2758_s21 = sshll.u32 %s2873_s3, 4  ;;  %s2759_s21 = int_to_ptr.vmem [resolvable:$false] %s2758_s21 }
  0xba   : > { %2279 = vmatprep.subr.bf16.mxu0 %v2863_v0  ;;  %2274 = vmatpush3.bf16.msra.mxu1 %v2493_v21  ;;  %v3202_v39 = vsub.s32 %v811_v32, %v781_v29 }
  0xbb   : > { %2287 = vmatprep.subr.bf16.mxu1 %v2863_v0 }
  0xbc   : > { %2268 = vmatmul.mubr.msk.bf16.vlgmr.msra.gmra.mxu0 %vm658_vm1, %v634_v5 }
  0xbd   : > { %2280 = vmatpush3.bf16.msra.mxu0 %v2490_v4  ;;  %2283 = vmatprep.mubr.msk.bf16.mxu0 %vm2864_vm0, %v2863_v0  ;;  %p3474_p12 = scmp.ne.s32.totalorder %s3470_s11, 0 }
  0xbe   : > { %2281 = vmatprep.subr.bf16.mxu0 %v2863_v0  ;;  %2276 = vmatmul.mubr.msk.bf16.vlgmr.msra.gmra.mxu1 %vm658_vm1, %v634_v5 }
  0xbf   : > { %2289 = vmatprep.mubr.msk.bf16.mxu1 %vm2864_vm0, %v2863_v0 }
  0xc1   : > { %2282 = vmatpush3.bf16.msra.mxu0 %v2491_v6 }
  0xc2   : > { %2293 = vmatprep.subr.bf16.mxu0 %v2863_v0 }
  0xc4   : > { %2284 = vmatmul.mubr.msk.bf16.vlgmr.msra.gmra.mxu0 %vm658_vm1, %v1075_v8 }
  0xc5   : > { %2295 = vmatprep.mubr.msk.bf16.mxu0 %vm2864_vm0, %v2863_v0 }
 0x17c   : > { %v696_v10 = vpop.f32.mrf.mxu0 }
 0x17d   : > { %v697_v11 = vadd.f32 %v2197_v9, %v696_v10 }
 0x17e   : > { %v2269_v12 = vpop.f32.mrf.mxu0 }
 0x17f   : > { %772 = vrot.lane.b32.xlu1 %v697_v11, %s2865_s14  ;;  %766 = vrot.lane.b32.xlu0 %v697_v11, %s2866_s22 }
 0x180   : > { %v699_v13 = vpop.f32.mrf.mxu0 }
 0x182   : > { %v2270_v14 = vpop.f32.mrf.mxu0 }
 0x183   : > { %769 = vrot.lane.b32.xlu0 %v697_v11, %s2867_s20 }
 0x184   : > { %v1137_v16 = vpop.f32.mrf.mxu0 }
 0x185   : > { %v1138_v18 = vadd.f32 %v2209_v15, %v1137_v16 }
 0x186   : > { %v2285_v19 = vpop.f32.mrf.mxu0 }
 0x187   : > { %1147 = vrot.lane.b32.xlu0 %v1138_v18, %s2867_s20  ;;  %1144 = vrot.lane.b32.xlu1 %v1138_v18, %s2866_s22 }
 0x188   : > { %v1140_v20 = vpop.f32.mrf.mxu0 }
 0x18a   : > { %v2286_v22 = vpop.f32.mrf.mxu0 }
 0x18b   : > { %1150 = vrot.lane.b32.xlu1 %v1138_v18, %s2865_s14 }
 0x1f1   : > { %v773_v30 = vpop.permute.xlu1 %772  ;;  %v767_v31 = vpop.permute.xlu0 %766 }
 0x1f2   : > { %v791_v34 = vcombine.low %v767_v31, %v773_v30  ;;  %v792_v35 = vcombine.high %v767_v31, %v773_v30 }
 0x1f4   : > { %v799_v40 = vrot.slane %v791_v34, %v3200_v33  ;;  %v806_v41 = vrot.slane %v792_v35, %v3200_v33 }
 0x1f5   : > { %v770_v36 = vpop.permute.xlu0 %769 }
 0x1f6   : > { %v775_v37 = vcombine.low %v697_v11, %v770_v36  ;;  %v776_v38 = vcombine.high %v697_v11, %v770_v36 }
 0x1f8   : > { %v783_v42 = vrot.slane %v775_v37, %v3200_v33  ;;  %v790_v43 = vrot.slane %v776_v38, %v3200_v33 }
 0x1f9   : > { %v1145_v44 = vpop.permute.xlu1 %1144  ;;  %v1148_v49 = vpop.permute.xlu0 %1147 }
 0x1fa   : > { %v807_v45 = vcombine.low %v783_v42, %v799_v40  ;;  %v808_v46 = vcombine.high %v783_v42, %v799_v40  ;;  %v823_v47 = vcombine.low %v790_v43, %v806_v41  ;;  %v824_v48 = vcombine.high %v790_v43, %v806_v41 }
 0x1fb   : > { %v1153_v54 = vcombine.low %v1138_v18, %v1148_v49  ;;  %v1154_v55 = vcombine.high %v1138_v18, %v1148_v49 }
 0x1fc   : > { %v815_v50 = vrot.slane %v807_v45, %v3202_v39  ;;  %v822_v51 = vrot.slane %v808_v46, %v3202_v39  ;;  %v831_v52 = vrot.slane %v823_v47, %v3202_v39  ;;  %v838_v53 = vrot.slane %v824_v48, %v3202_v39 }
 0x1fd   : > { %v1151_v56 = vpop.permute.xlu1 %1150  ;;  %v1161_v4 = vrot.slane %v1153_v54, %v3200_v33  ;;  %v1168_v5 = vrot.slane %v1154_v55, %v3200_v33 }
 0x1fe   : > { %v843_v57 = vcombine.low %v815_v50, %v822_v51  ;;  %v2205_v58 = vcombine.high %v815_v50, %v822_v51  ;;  %v859_v59 = vcombine.low %v831_v52, %v838_v53  ;;  %v2206_v60 = vcombine.high %v831_v52, %v838_v53 }
 0x1ff   : > { %v1169_v61 = vcombine.low %v1145_v44, %v1151_v56  ;;  %v1170_v62 = vcombine.high %v1145_v44, %v1151_v56 }
 0x200   : > { %v850_v63 = vrot.slane %v843_v57, %v3200_v33  ;;  %v858_v1 = vrot.slane %v2205_v58, %v3200_v33  ;;  %v866_v2 = vrot.slane %v859_v59, %v3200_v33  ;;  %v874_v3 = vrot.slane %v2206_v60, %v3200_v33 }
 0x201   : > { %v1177_v6 = vrot.slane %v1169_v61, %v3200_v33  ;;  %v1184_v8 = vrot.slane %v1170_v62, %v3200_v33 }
 0x202   : > { %v875_v9 = vcombine.low %v850_v63, %v858_v1  ;;  %v876_v10 = vcombine.high %v850_v63, %v858_v1  ;;  %v891_v11 = vcombine.low %v866_v2, %v874_v3  ;;  %v892_v12 = vcombine.high %v866_v2, %v874_v3 }
 0x203   : > { %v1185_v13 = vcombine.low %v1161_v4, %v1177_v6  ;;  %v1186_v14 = vcombine.high %v1161_v4, %v1177_v6  ;;  %v1201_v15 = vcombine.low %v1168_v5, %v1184_v8  ;;  %v1202_v16 = vcombine.high %v1168_v5, %v1184_v8  ;;  %v759_v4 = vpop.f32.mrf.mxu1 }
 0x204   : > { %v883_v17 = vrot.slane %v875_v9, %v3202_v39  ;;  %v890_v18 = vrot.slane %v876_v10, %v3202_v39  ;;  %v899_v19 = vrot.slane %v891_v11, %v3202_v39  ;;  %v906_v20 = vrot.slane %v892_v12, %v3202_v39  ;;  %v1297_v9 = vld [vmem:[%s551_s18] sm:$0xff] }
 0x205   : > { %v1193_v21 = vrot.slane %v1185_v13, %v3202_v39  ;;  %v1200_v22 = vrot.slane %v1186_v14, %v3202_v39  ;;  %v1209_v23 = vrot.slane %v1201_v15, %v3202_v39  ;;  %v1216_v24 = vrot.slane %v1202_v16, %v3202_v39  ;;  %v2277_v5 = vpop.f32.mrf.mxu1 }
 0x206   : > { %v907_v25 = vcombine.low %v883_v17, %v899_v19  ;;  %v908_v26 = vcombine.high %v883_v17, %v899_v19  ;;  %v909_v27 = vcombine.low %v890_v18, %v906_v20  ;;  %v910_v28 = vcombine.high %v890_v18, %v906_v20 }
 0x207   : > { %v1221_v29 = vcombine.low %v1193_v21, %v1200_v22  ;;  %v2213_v30 = vcombine.high %v1193_v21, %v1200_v22  ;;  %v1237_v31 = vcombine.low %v1209_v23, %v1216_v24  ;;  %v2214_v32 = vcombine.high %v1209_v23, %v1216_v24  ;;  %v762_v6 = vpop.f32.mrf.mxu1 }
 0x208   : > { %v911_v34 = vpack.c.bf16 %v907_v25, %v907_v25  ;;  %v912_v35 = vpack.c.bf16 %v908_v26, %v908_v26  ;;  %v913_v36 = vpack.c.bf16 %v909_v27, %v909_v27  ;;  %v914_v37 = vpack.c.bf16 %v910_v28, %v910_v28 }
 0x209   : > { %v1228_v38 = vrot.slane %v1221_v29, %v3200_v33  ;;  %v1236_v40 = vrot.slane %v2213_v30, %v3200_v33  ;;  %v1244_v41 = vrot.slane %v1237_v31, %v3200_v33  ;;  %v1252_v42 = vrot.slane %v2214_v32, %v3200_v33  ;;  %v2278_v8 = vpop.f32.mrf.mxu1 }
 0x20a   : > { %916 = vst.msk [vmem:[#allocation2] sm:$0xf] %vm915_vm2, %v911_v34  ;;  %917 = vst.msk [vmem:[#allocation2 + $0x4] sm:$0xf] %vm915_vm2, %v912_v35  ;;  %vm1298_vm4 = vcmp.eq.s32.totalorder %v1297_v9, 0 }
 0x20b   : > { %918 = vst.msk [vmem:[#allocation2 + $0x8] sm:$0xf] %vm915_vm2, %v913_v36  ;;  %919 = vst.msk [vmem:[#allocation2 + $0xc] sm:$0xf] %vm915_vm2, %v914_v37  ;;  %v1253_v43 = vcombine.low %v1228_v38, %v1236_v40  ;;  %v1269_v44 = vcombine.low %v1244_v41, %v1252_v42  ;;  %v1254_v51 = vcombine.high %v1228_v38, %v1236_v40  ;;  %v1299_v10 = vsel %vm1298_vm4, -1e+10, %v2863_v0 }
 0x20c   : > { %v1270_v52 = vcombine.high %v1244_v41, %v1252_v42  ;;  %v2201_v36 = vld [vmem:[#allocation18] ss:$0 sm:$0xff] }
 0x20d   : > { %v1261_v45 = vrot.slane %v1253_v43, %v3202_v39  ;;  %v1277_v46 = vrot.slane %v1269_v44, %v3202_v39  ;;  %v1268_v59 = vrot.slane %v1254_v51, %v3202_v39  ;;  %v760_v37 = vadd.f32 %v2201_v36, %v759_v4 }
 0x20e   : > { %v1284_v60 = vrot.slane %v1270_v52, %v3202_v39 }
 0x20f   : > { %v1285_v53 = vcombine.low %v1261_v45, %v1277_v46  ;;  %v1286_v54 = vcombine.high %v1261_v45, %v1277_v46 }
 0x210   : > { %v1287_v63 = vcombine.low %v1268_v59, %v1284_v60  ;;  %v1288_v1 = vcombine.high %v1268_v59, %v1284_v60 }
 0x211   : > { %v1293_v47 = vld [vmem:[#allocation2] sm:$0xf]  ;;  %v1294_v48 = vld [vmem:[#allocation2 + $0x4] sm:$0xf]  ;;  %v1289_v57 = vpack.c.bf16 %v1285_v53, %v1285_v53  ;;  %v1290_v58 = vpack.c.bf16 %v1286_v54, %v1286_v54 }
 0x212   : > { %v1305_v49 = vsel %vm1300_vm3, %v1293_v47, 0  ;;  %v1351_v50 = vsel %vm1300_vm3, %v1294_v48, 0  ;;  %v1295_v55 = vld [vmem:[#allocation2 + $0x8] sm:$0xf]  ;;  %v1296_v56 = vld [vmem:[#allocation2 + $0xc] sm:$0xf]  ;;  %v1291_v2 = vpack.c.bf16 %v1287_v63, %v1287_v63  ;;  %v1292_v3 = vpack.c.bf16 %v1288_v1, %v1288_v1 }
 0x213   : > { %2288 = vmatpush3.bf16.xpose.msra.mxu1 %v1305_v49  ;;  %2294 = vmatpush3.bf16.xpose.msra.mxu0 %v1351_v50  ;;  %v1397_v61 = vsel %vm1300_vm3, %v1295_v55, 0  ;;  %v1443_v62 = vsel %vm1300_vm3, %v1296_v56, 0 }
 0x214   : > { %2299 = vmatprep.subr.bf16.mxu1 %v2863_v0  ;;  %2305 = vmatprep.subr.bf16.mxu0 %v2863_v0 }
 0x21a   : > { %2290 = vmatmul.mubr.msk.bf16.vlgmr.msra.gmra.mxu1 %vm1300_vm3, %v1289_v57  ;;  %2296 = vmatmul.mubr.msk.bf16.vlgmr.msra.gmra.mxu0 %vm1300_vm3, %v1290_v58 }
 0x21b   : > { %2300 = vmatpush3.bf16.xpose.msra.mxu1 %v1397_v61  ;;  %2306 = vmatpush3.bf16.xpose.msra.mxu0 %v1443_v62 }
 0x21c   : > { %2301 = vmatprep.mubr.msk.bf16.mxu1 %vm2864_vm0, %v2863_v0  ;;  %2307 = vmatprep.mubr.msk.bf16.mxu0 %vm2864_vm0, %v2863_v0 }
 0x21d   : > { %2311 = vmatprep.subr.bf16.mxu1 %v2863_v0  ;;  %2317 = vmatprep.subr.bf16.mxu0 %v2863_v0 }
 0x222   : > { %2302 = vmatmul.mubr.msk.bf16.vlgmr.msra.gmra.mxu1 %vm1300_vm3, %v1291_v2  ;;  %2308 = vmatmul.mubr.msk.bf16.vlgmr.msra.gmra.mxu0 %vm1300_vm3, %v1292_v3 }
 0x223   : > { %2313 = vmatprep.mubr.msk.bf16.mxu1 %vm2864_vm0, %v2863_v0  ;;  %2319 = vmatprep.mubr.msk.bf16.mxu0 %vm2864_vm0, %v2863_v0 }
 0x2da   : > { %v1341_v11 = vpop.f32.mrf.mxu1  ;;  %v1387_v12 = vpop.f32.mrf.mxu0 }
 0x2db   : > { %v1342_v13 = vadd.f32 %v1341_v11, %v1299_v10  ;;  %v1388_v14 = vadd.f32 %v1387_v12, %v1299_v10 }
 0x2dc   : > { %v2291_v15 = vpop.f32.mrf.mxu1  ;;  %v2297_v16 = vpop.f32.mrf.mxu0 }
 0x2dd   : > { %v1485_v17 = vsel %vm1300_vm3, %v1342_v13, -inf  ;;  %v1488_v18 = vsel %vm1300_vm3, %v1388_v14, -inf }
 0x2de   : > { %1486 = vmax.xlane.f32.xlu0 %v1485_v17  ;;  %v1344_v19 = vpop.f32.mrf.mxu1  ;;  %1489 = vmax.xlane.f32.xlu1 %v1488_v18  ;;  %v1390_v20 = vpop.f32.mrf.mxu0 }
 0x2e0   : > { %v2292_v21 = vpop.f32.mrf.mxu1  ;;  %v2298_v22 = vpop.f32.mrf.mxu0 }
 0x2e2   : > { %v1433_v23 = vpop.f32.mrf.mxu1  ;;  %v1479_v24 = vpop.f32.mrf.mxu0 }
 0x2e3   : > { %v1434_v25 = vadd.f32 %v1433_v23, %v1299_v10  ;;  %v1480_v28 = vadd.f32 %v1479_v24, %v1299_v10 }
 0x2e4   : > { %v2303_v26 = vpop.f32.mrf.mxu1  ;;  %v2309_v27 = vpop.f32.mrf.mxu0 }
 0x2e5   : > { %v1491_v29 = vsel %vm1300_vm3, %v1434_v25, -inf  ;;  %v1494_v35 = vsel %vm1300_vm3, %v1480_v28, -inf }
 0x2e6   : > { %1492 = vmax.xlane.f32.xlu0 %v1491_v29  ;;  %v1436_v30 = vpop.f32.mrf.mxu1  ;;  %v1482_v31 = vpop.f32.mrf.mxu0 }
 0x2e8   : > { %v2304_v32 = vpop.f32.mrf.mxu1  ;;  %v2310_v34 = vpop.f32.mrf.mxu0 }
 0x2ea   : > { %1495 = vmax.xlane.f32.xlu0 %v1494_v35 }
 0x2ef   : > { %921 = vrot.lane.b32.xlu1 %v760_v37, %s2866_s22  ;;  %s2232_s22 = sshll.u32 %s2842_s28, 7  ;;  %s2760_s28 = scalar_lea.vmem %s2759_s21, 256 }
 0x2f3   : > { %927 = vrot.lane.b32.xlu1 %v760_v37, %s2865_s14  ;;  %s3472_s14 = sld [smem:[#allocation37_spill]] }
 0x300   : > { %924 = vrot.lane.b32.xlu0 %v760_v37, %s2867_s20  ;;  %s627_s20 = scalar_lea.vmem [#allocation19], %s3140_s30 }
 0x301   : > { %s1989_s23 = sshll.u32 %s627_s20, 4  ;;  %s1990_s23 = int_to_ptr.vmem [resolvable:$true] %s1989_s23 }
 0x302   : > { %p2761_p13 = scmp.lt.s32.totalorder %s1990_s23, %s2759_s21 }
 0x367   : > { %v1487_v38 = vpop.xlane.xlu0 %1486  ;;  %v1490_v40 = vpop.xlane.xlu1 %1489 }
 0x368   : > { %v1497_v41 = vsub.f32 %v1342_v13, %v1487_v38  ;;  %v1498_v42 = vsub.f32 %v1388_v14, %v1490_v40 }
 0x36a   : > { %v1501_v43 = vmul.f32 1.442695, %v1497_v41  ;;  %v1503_v44 = vmul.f32 1.442695, %v1498_v42 }
 0x36b   : > { %v922_v45 = vpop.permute.xlu1 %921 }
 0x36c   : > { %2496 = vpow2.f32 %v1501_v43 }
 0x36d   : > { %2498 = vpow2.f32 %v1503_v44 }
 0x36f   : > { %v1493_v46 = vpop.xlane.xlu0 %1492  ;;  %v928_v49 = vpop.permute.xlu1 %927 }
 0x370   : > { %v1499_v47 = vsub.f32 %v1434_v25, %v1493_v46  ;;  %v946_v52 = vcombine.low %v922_v45, %v928_v49  ;;  %v947_v53 = vcombine.high %v922_v45, %v928_v49 }
 0x372   : > { %v1505_v48 = vmul.f32 1.442695, %v1499_v47  ;;  %v954_v59 = vrot.slane %v946_v52, %v3200_v33  ;;  %v961_v61 = vrot.slane %v947_v53, %v3200_v33 }
 0x373   : > { %v1496_v50 = vpop.xlane.xlu0 %1495 }
 0x374   : > { %2500 = vpow2.f32 %v1505_v48  ;;  %v1500_v51 = vsub.f32 %v1480_v28, %v1496_v50 }
 0x376   : > { %v1507_v54 = vmul.f32 1.442695, %v1500_v51 }
 0x377   : > { %v925_v55 = vpop.permute.xlu0 %924 }
 0x378   : > { %2502 = vpow2.f32 %v1507_v54  ;;  %v930_v56 = vcombine.low %v760_v37, %v925_v55  ;;  %v931_v57 = vcombine.high %v760_v37, %v925_v55 }
 0x379   : > { %v3270_v58 = vpop.eup %2496 }
 0x37a   : > { %v3273_v60 = vpop.eup %2498  ;;  %v938_v62 = vrot.slane %v930_v56, %v3200_v33  ;;  %v945_v63 = vrot.slane %v931_v57, %v3200_v33  ;;  %v1509_v1 = vsel %vm1300_vm3, %v3270_v58, 0.0 }
 0x37b   : > { %1510 = vadd.xlane.f32.xlu1 %v1509_v1  ;;  %v1512_v2 = vsel %vm1300_vm3, %v3273_v60, 0.0 }
 0x37c   : > { %v962_v3 = vcombine.low %v938_v62, %v954_v59  ;;  %v963_v4 = vcombine.high %v938_v62, %v954_v59  ;;  %v978_v5 = vcombine.low %v945_v63, %v961_v61  ;;  %v979_v6 = vcombine.high %v945_v63, %v961_v61  ;;  %1513 = vadd.xlane.f32.xlu0 %v1512_v2 }
 0x37e   : > { %v970_v8 = vrot.slane %v962_v3, %v3202_v39  ;;  %v977_v9 = vrot.slane %v963_v4, %v3202_v39  ;;  %v986_v10 = vrot.slane %v978_v5, %v3202_v39  ;;  %v993_v11 = vrot.slane %v979_v6, %v3202_v39 }
 0x380   : > { %v998_v12 = vcombine.low %v970_v8, %v977_v9  ;;  %v2207_v13 = vcombine.high %v970_v8, %v977_v9  ;;  %v1014_v14 = vcombine.low %v986_v10, %v993_v11  ;;  %v2208_v15 = vcombine.high %v986_v10, %v993_v11 }
 0x381   : > { %v3286_v16 = vpop.eup %2500 }
 0x382   : > { %v1005_v17 = vrot.slane %v998_v12, %v3200_v33  ;;  %v1013_v18 = vrot.slane %v2207_v13, %v3200_v33  ;;  %v1021_v19 = vrot.slane %v1014_v14, %v3200_v33  ;;  %v1029_v20 = vrot.slane %v2208_v15, %v3200_v33 }
 0x383   : > { %v1515_v21 = vsel %vm1300_vm3, %v3286_v16, 0.0 }
 0x384   : > { %v1030_v22 = vcombine.low %v1005_v17, %v1013_v18  ;;  %v1031_v23 = vcombine.high %v1005_v17, %v1013_v18  ;;  %v1046_v24 = vcombine.low %v1021_v19, %v1029_v20  ;;  %v1047_v25 = vcombine.high %v1021_v19, %v1029_v20  ;;  %1516 = vadd.xlane.f32.xlu0 %v1515_v21 }
 0x385   : > { %v2503_v26 = vpop.eup %2502 }
 0x386   : > { %v1038_v27 = vrot.slane %v1030_v22, %v3202_v39  ;;  %v1045_v28 = vrot.slane %v1031_v23, %v3202_v39  ;;  %v1054_v29 = vrot.slane %v1046_v24, %v3202_v39  ;;  %v1061_v30 = vrot.slane %v1047_v25, %v3202_v39 }
 0x387   : > { %v1518_v31 = vsel %vm1300_vm3, %v2503_v26, 0.0 }
 0x388   : > { %v1062_v32 = vcombine.low %v1038_v27, %v1054_v29  ;;  %v1063_v34 = vcombine.high %v1038_v27, %v1054_v29  ;;  %v1064_v35 = vcombine.low %v1045_v28, %v1061_v30  ;;  %v1065_v36 = vcombine.high %v1045_v28, %v1061_v30  ;;  %1519 = vadd.xlane.f32.xlu1 %v1518_v31  ;;  %v2494_v31 = vld [vmem:[%s3411_s9 + $0x8] sm:$0xff]  }
 0x38a   : > { %v1066_v37 = vpack.c.bf16 %v1062_v32, %v1062_v32  ;;  %v1067_v38 = vpack.c.bf16 %v1063_v34, %v1063_v34  ;;  %v1068_v40 = vpack.c.bf16 %v1064_v35, %v1064_v35  ;;  %v1069_v41 = vpack.c.bf16 %v1065_v36, %v1065_v36 }
 0x38c   : > { %1070 = vst.msk [vmem:[#allocation3] sm:$0xf] %vm915_vm2, %v1066_v37  ;;  %1071 = vst.msk [vmem:[#allocation3 + $0x4] sm:$0xf] %vm915_vm2, %v1067_v38 }
 0x38d   : > { %1072 = vst.msk [vmem:[#allocation3 + $0x8] sm:$0xf] %vm915_vm2, %v1068_v40  ;;  %1073 = vst.msk [vmem:[#allocation3 + $0xc] sm:$0xf] %vm915_vm2, %v1069_v41 }
 0x393   : > { %v1533_v42 = vld [vmem:[#allocation3] sm:$0xf]  ;;  %v1534_v43 = vld [vmem:[#allocation3 + $0x4] sm:$0xf] }
 0x394   : > { %v1542_v44 = vsel %vm1540_vm5, %v1533_v42, 0  ;;  %v1588_v45 = vsel %vm1540_vm5, %v1534_v43, 0  ;;  %v1535_v54 = vld [vmem:[#allocation3 + $0x8] sm:$0xf]  ;;  %v1536_v56 = vld [vmem:[#allocation3 + $0xc] sm:$0xf] }
 0x395   : > { %2312 = vmatpush3.bf16.msra.mxu1 %v1542_v44  ;;  %2318 = vmatpush3.bf16.msra.mxu0 %v1588_v45  ;;  %v1634_v59 = vsel %vm1540_vm5, %v1535_v54, 0  ;;  %v1680_v61 = vsel %vm1540_vm5, %v1536_v56, 0  ;;  %v2495_v43 = vld [vmem:[%s3411_s9] sm:$0xff]  }
 0x396   : > { %2323 = vmatprep.subr.bf16.mxu1 %v2863_v0  ;;  %2329 = vmatprep.subr.bf16.mxu0 %v2863_v0 }
 0x404   : > { %v1511_v46 = vpop.xlane.xlu1 %1510 }
 0x405   : > { %2504 = vrcp.f32 %v1511_v46  ;;  %v1514_v47 = vpop.xlane.xlu0 %1513 }
 0x406   : > { %2506 = vrcp.f32 %v1514_v47 }
 0x40d   : > { %v1517_v48 = vpop.xlane.xlu0 %1516 }
 0x40e   : > { %2508 = vrcp.f32 %v1517_v48 }
 0x411   : > { %v1520_v49 = vpop.xlane.xlu1 %1519 }
 0x412   : > { %v2505_v50 = vpop.eup %2504  ;;  %2510 = vrcp.f32 %v1520_v49 }
 0x413   : > { %v2507_v51 = vpop.eup %2506  ;;  %v1525_v52 = vmul.f32 %v2505_v50, %v3270_v58 }
 0x414   : > { %v1526_v53 = vmul.f32 %v2507_v51, %v3273_v60 }
 0x415   : > { %v1529_v55 = vpack.c.bf16 %v1525_v52, %v1525_v52 }
 0x416   : > { %v1530_v57 = vpack.c.bf16 %v1526_v53, %v1526_v53 }
 0x417   : > { %2314 = vmatmul.mubr.msk.bf16.vlgmr.msra.gmra.mxu1 %vm1300_vm3, %v1529_v55 }
 0x418   : > { %2320 = vmatmul.mubr.msk.bf16.vlgmr.msra.gmra.mxu0 %vm1300_vm3, %v1530_v57  ;;  %2324 = vmatpush3.bf16.msra.mxu1 %v1634_v59 }
 0x419   : > { %2330 = vmatpush3.bf16.msra.mxu0 %v1680_v61  ;;  %2325 = vmatprep.mubr.msk.bf16.mxu1 %vm2864_vm0, %v2863_v0 }
 0x41a   : > { %2331 = vmatprep.mubr.msk.bf16.mxu0 %vm2864_vm0, %v2863_v0  ;;  %2335 = vmatprep.subr.bf16.mxu1 %v2863_v0 }
 0x41b   : > { %v2509_v58 = vpop.eup %2508 }
 0x41c   : > { %v1527_v60 = vmul.f32 %v2509_v58, %v3286_v16 }
 0x41e   : > { %v1531_v62 = vpack.c.bf16 %v1527_v60, %v1527_v60 }
 0x41f   : > { %v2511_v63 = vpop.eup %2510 }
 0x420   : > { %2326 = vmatmul.mubr.msk.bf16.vlgmr.msra.gmra.mxu1 %vm1300_vm3, %v1531_v62  ;;  %v1528_v1 = vmul.f32 %v2511_v63, %v2503_v26 }
 0x421   : > { %2339 = vmatprep.mubr.msk.bf16.mxu1 %vm2864_vm0, %v2863_v0  ;;  %2336 = vmatpush3.bf16.msra.mxu1 %v2494_v31 }
 0x422   : > { %v1532_v2 = vpack.c.bf16 %v1528_v1, %v1528_v1  ;;  %2337 = vmatprep.subr.bf16.mxu1 %v2863_v0  ;;  %v2225_v1 = vld [vmem:[%s3412_s10] ss:$0 sm:$0xff] }
 0x424   : > { %2332 = vmatmul.mubr.msk.bf16.vlgmr.msra.gmra.mxu0 %vm1300_vm3, %v1532_v2 }
 0x425   : > { %2338 = vmatpush3.bf16.msra.mxu1 %v2495_v43 }
 0x4d7   : > { %v1578_v3 = vpop.f32.mrf.mxu1 }
 0x4d8   : > { %v1624_v4 = vpop.f32.mrf.mxu0 }
 0x4d9   : > { %v2315_v5 = vpop.f32.mrf.mxu1 }
 0x4da   : > { %v2321_v6 = vpop.f32.mrf.mxu0 }
 0x4db   : > { %v1581_v8 = vpop.f32.mrf.mxu1 }
 0x4dc   : > { %v1627_v9 = vpop.f32.mrf.mxu0 }
 0x4dd   : > { %v2316_v10 = vpop.f32.mrf.mxu1 }
 0x4de   : > { %v2322_v11 = vpop.f32.mrf.mxu0 }
 0x4e0   : > { %v1670_v12 = vpop.f32.mrf.mxu1 }
 0x4e1   : > { %v1722_v14 = vcombine.low %v1578_v3, %v1670_v12  ;;  %v1723_v15 = vcombine.high %v1578_v3, %v1670_v12 }
 0x4e2   : > { %v2327_v13 = vpop.f32.mrf.mxu1 }
 0x4e3   : > { %v1730_v22 = vrot.slane %v1722_v14, %v3200_v33  ;;  %v1737_v23 = vrot.slane %v1723_v15, %v3200_v33 }
 0x4e4   : > { %v1673_v16 = vpop.f32.mrf.mxu1  ;;  %v1716_v17 = vpop.f32.mrf.mxu0 }
 0x4e5   : > { %v1738_v18 = vcombine.low %v1624_v4, %v1716_v17  ;;  %v1739_v19 = vcombine.high %v1624_v4, %v1716_v17 }
 0x4e6   : > { %v2328_v20 = vpop.f32.mrf.mxu1  ;;  %v2333_v21 = vpop.f32.mrf.mxu0 }
 0x4e7   : > { %v1746_v24 = vrot.slane %v1738_v18, %v3200_v33  ;;  %v1753_v25 = vrot.slane %v1739_v19, %v3200_v33  ;;  %v2229_v18 = vld [vmem:[%s3471_s29] ss:$0 sm:$0xff] }
 0x4e8   : > { %v1719_v26 = vpop.f32.mrf.mxu0  ;;  %v2230_v20 = vld [vmem:[%s3472_s14] ss:$0 sm:$0xff] }
 0x4e9   : > { %v1754_v27 = vcombine.low %v1730_v22, %v1746_v24  ;;  %v1755_v28 = vcombine.high %v1730_v22, %v1746_v24  ;;  %v1770_v29 = vcombine.low %v1737_v23, %v1753_v25  ;;  %v1771_v30 = vcombine.high %v1737_v23, %v1753_v25 }
 0x4ea   : > { %v2334_v32 = vpop.f32.mrf.mxu0 }
 0x4eb   : > { %v1762_v34 = vrot.slane %v1754_v27, %v3202_v39  ;;  %v1769_v35 = vrot.slane %v1755_v28, %v3202_v39  ;;  %v1778_v36 = vrot.slane %v1770_v29, %v3202_v39  ;;  %v1785_v37 = vrot.slane %v1771_v30, %v3202_v39 }
 0x4ed   : > { %v1790_v38 = vcombine.low %v1762_v34, %v1769_v35  ;;  %v2223_v40 = vcombine.high %v1762_v34, %v1769_v35  ;;  %v1806_v41 = vcombine.low %v1778_v36, %v1785_v37  ;;  %v2224_v42 = vcombine.high %v1778_v36, %v1785_v37 }
 0x4ef   : > { %v1797_v44 = vrot.slane %v1790_v38, %v3200_v33  ;;  %v1805_v45 = vrot.slane %v2223_v40, %v3200_v33  ;;  %v1813_v46 = vrot.slane %v1806_v41, %v3200_v33  ;;  %v1821_v47 = vrot.slane %v2224_v42, %v3200_v33 }
 0x4f1   : > { %v1823_v48 = vcombine.high %v1797_v44, %v1805_v45  ;;  %v1839_v49 = vcombine.high %v1813_v46, %v1821_v47  ;;  %v1822_v0 = vcombine.low %v1797_v44, %v1805_v45  ;;  %v1838_v50 = vcombine.low %v1813_v46, %v1821_v47 }
 0x4f3   : > { %v1837_v51 = vrot.slane %v1823_v48, %v3202_v39  ;;  %v1853_v52 = vrot.slane %v1839_v49, %v3202_v39  ;;  %v1830_v53 = vrot.slane %v1822_v0, %v3202_v39  ;;  %v1846_v54 = vrot.slane %v1838_v50, %v3202_v39 }
 0x4f5   : > { %v1856_v55 = vcombine.low %v1837_v51, %v1853_v52  ;;  %v1855_v56 = vcombine.high %v1830_v53, %v1846_v54  ;;  %v1854_v57 = vcombine.low %v1830_v53, %v1846_v54  ;;  %v1857_v33 = vcombine.high %v1837_v51, %v1853_v52 }
 0x4f7   : > { %1863 = vrot.lane.b32.xlu1 %v1856_v55, %s2870_s25  ;;  %1859 = vrot.lane.b32.xlu0 %v1855_v56, %s2871_s17  ;;  %s1987_s25 = scalar_lea.hbm %s3473_s13, %s2232_s22  ;;  %s1975_s17 = scalar_lea.sflag [#allocation6], %s3137_s7 }
 0x4fb   : > { %1867 = vrot.lane.b32.xlu1 %v1857_v33, %s2872_s19  ;;  %s2754_s19 = scalar_lea.vmem %s1990_s23, 128 }
 0x4fc   : > { %p2755_p1 = scmp.ne.s32.totalorder %s1990_s23, %s2754_s19  ;;  %p2762_p6 = scmp.lt.s32.totalorder %s2760_s28, %s2754_s19 }
 0x4fe   : > { %p2756_p10 = pnand %p2755_p1, %p3474_p12  ;;  %p2763_p2 = por %p2762_p6, %p2761_p13 }
 0x500   : > { %p2757_p7 = pneg %p2756_p10 }
 0x502   : > { %p2764_p11 = pnand %p2763_p2, %p2757_p7 }
 0x569   : > { %v1864_v59 = vpop.permute.xlu1 %1863  ;;  %v1860_v61 = vpop.permute.xlu0 %1859 }
 0x56a   : > { %v1870_v58 = vsel %vm1300_vm3, %v1854_v57, %v1860_v61 }
 0x56b   : > { %v1872_v62 = vsel %vm1871_vm6, %v1870_v58, %v1864_v59 }
 0x56d   : > { %v1868_v60 = vpop.permute.xlu1 %1867 }
 0x56e   : > { %v1874_v63 = vsel %vm1873_vm7, %v1872_v62, %v1868_v60 }
 0x56f   : > { %v1875_v39 = vpack.c.bf16 %v1874_v63, %v1874_v63 }
 0x571   : > { %2340 = vmatmul.mubr.msk.bf16.vlgmr.msra.gmra.mxu1 %vm658_vm1, %v1875_v39 }
 0x631   : > { %v1936_v2 = vpop.f32.mrf.mxu1 }
 0x632   : > { %v1937_v3 = vadd.f32 %v2225_v1, %v1936_v2 }
 0x633   : > { %v2341_v4 = vpop.f32.mrf.mxu1 }
 0x634   : > { %v1942_v5 = vadd.f32 %v1937_v3, %v3180_v7 }
 0x635   : > { %v1939_v6 = vpop.f32.mrf.mxu1 }
 0x636   : > { %v1943_v8 = vsel %vm658_vm1, %v1942_v5, 0.0 }
 0x637   : > { %1944 = vadd.xlane.f32.xlu0 %v1943_v8  ;;  %v2342_v9 = vpop.f32.mrf.mxu1 }
 0x6c0   : > { %v1945_v10 = vpop.xlane.xlu0 %1944 }
 0x6c1   : > { %v1947_v11 = vmul.f32 0.03125, %v1945_v10 }
 0x6c3   : > { %v1948_v12 = vsub.f32 %v1942_v5, %v1947_v11 }
 0x6c5   : > { %v1949_v13 = vmul.f32 %v1948_v12, %v1948_v12 }
 0x6c7   : > { %v1950_v14 = vsel %vm658_vm1, %v1949_v13, 0.0 }
 0x6c8   : > { %1951 = vadd.xlane.f32.xlu1 %v1950_v14 }
 0x751   : > { %v1952_v15 = vpop.xlane.xlu1 %1951 }
 0x752   : > { %v1953_v16 = vmul.f32 0.03125, %v1952_v15 }
 0x754   : > { %v1954_v17 = vadd.f32 1e-05, %v1953_v16 }
 0x756   : > { %2512 = vrsqrt.f32 %v1954_v17 }
 0x763   : > { %v2513_v7 = vpop.eup %2512 }
 0x764   : > { %v1956_v19 = vmul.f32 %v2513_v7, %v1948_v12 }
 0x766   : > { %v1964_v21 = vmul.f32 %v2229_v18, %v1956_v19 }
 0x768   : > { %v1972_v22 = vadd.f32 %v2230_v20, %v1964_v21 }
 0x76a   : > { %1973 = vst.msk [vmem:[%s627_s20] sm:$0xff] %vm658_vm1, %v1972_v22 }
 0x76b   : > { %2767 = shalt.err (!%p2764_p11)
}
 0x76c   : > { %s2768_s30 = scalar_lea.hbm %s1987_s25, 128  ;;  %s2772_s5 = scalar_lea.hbm %s3473_s13, 256 }
 0x76d   : > { %p2769_p3 = scmp.ne.s32.totalorder %s1987_s25, %s2768_s30  ;;  %p2773_p4 = scmp.lt.s32.totalorder %s1987_s25, %s3473_s13 }
 0x76e   : > { %p2774_p8 = scmp.lt.s32.totalorder %s2772_s5, %s2768_s30 }
 0x76f   : > { %p2770_p5 = pnand %p2769_p3, %p3474_p12 }
 0x770   : > { %p2775_p9 = por %p2774_p8, %p2773_p4 }
 0x771   : > { %p2771_p0 = pneg %p2770_p5 }
 0x773   : > { %p2776_p1 = pnand %p2775_p9, %p2771_p0 }
 0x775   : > { %2779 = shalt.err (!%p2776_p1)
}
 0x776   : > { %2373 = dma.vmem_to_hbm [thread:$0]  (%p3474_p12), %s1990_s23, 128, %s1987_s25, %s1975_s17  }
 0x777 PF: > { %s3475_s18 = sld [smem:[#allocation26_spill]] }
 0x778   : > { %s3476_s14 = sld [smem:[#allocation32_spill]] }
 0x779   : > { %s3477_s22 = sld [smem:[#allocation28_spill]] }
 0x77d   : > { %s2001_s20 = sand.u32 1, %s3475_s18  }
 0x77e   : > { %p3478_p10 = scmp.ne.s32.totalorder %s3476_s14, 0  ;;  %s2002_s12 = scalar_lea.sflag [#allocation6], %s2001_s20 }
 0x77f   : > { %p3479_p7 = scmp.ge.s32.totalorder %s3477_s22, 2 }
 0x781   : > { %p2405_p13 = pnand %p3479_p7, %p3478_p10 }
 0x783   : > { %p2406_p6 = pneg %p2405_p13 }
 0x785   : > { %2825 = dma.done.wait (%p2406_p6), %s2002_s12, 128  }
 0x786   : > { %2827 = vsyncadd (%p2406_p6), %s2002_s12, 4294967168  ;;  %s35_s30 = sadd.s32 1, %s3477_s22   ;;  %s3480_s24 = sld [smem:[#allocation31_spill]] }
 0x787   : > { %p32_p2 = scmp.ge.s32.totalorder %s35_s30, 4   ;;  %s3481_s28 = sld [smem:[#allocation27_spill]] }
 0x788   : > { %s3482_s29 = sld [smem:[#allocation29_spill]]  ;;  %s3483_s25 = smov %s2834_s26 }
 0x789   : > { %s3484_s26 = smov %s2838_s27  ;;  %34 = sbr.rel (!%p32_p2) target bundleno = 18 (0x12), region = 169 }
 0x78c   : > { %s3485_s27 = smov %s3480_s24 }
 0x78e   :  { %2007 = vsyncpa [#allocation5], 1 }
 0x78f   :  { %2009 = vsyncpa [#allocation5 + $0x1], 1 }
 0x790   :  { %2010 = vsyncpa [#allocation8], 1 }
 0x791   :  { %2012 = vsyncpa [#allocation8 + $0x1], 1 }
 0x792   :  { %2013 = vsyncpa [#allocation11], 1 }
 0x793   :  { %2014 = vsyncpa [#allocation14], 1 }
 0x794   :  { %2015 = vsyncpa [#allocation17], 1 }
 0x795   :  { %2016 = vsyncpa [#allocation6], 1 }
 0x796   :  { %2018 = vsyncpa [#allocation6 + $0x1], 1 }

</bundles_post_ra>
